<compile_context>
chip_gen: v7x
topology: tpu7x:2x2x1
jax: 0.10.0
libtpu: 0.0.40
codegen_flags: <defaults>
</compile_context>

<pallas_src>
import functools

import jax
import jax.numpy as jnp
from jax.experimental import pallas as pl
from jax.experimental.pallas import tpu as pltpu

EPS = 1e-5
EXPANSION = 4


# ----------------------------- Pallas kernels ------------------------------

def _bn_train(y, gamma, beta):
    # Training-mode BatchNorm, one-pass statistics (sum and sum-of-squares).
    inv_m = 1.0 / y.shape[0]
    mu = jnp.sum(y, axis=0, keepdims=True) * inv_m
    ex2 = jnp.sum(y * y, axis=0, keepdims=True) * inv_m
    var = ex2 - mu * mu
    scale = gamma * jax.lax.rsqrt(var + EPS)
    return (y - mu) * scale + beta


def conv1_bn_relu_kernel(x_ref, w_ref, g_ref, be_ref, o_ref):
    # 1x1 conv == channel matmul; conv bias omitted (cancelled by BN mean).
    y = jnp.dot(x_ref[...], w_ref[...], preferred_element_type=jnp.float32)
    o_ref[...] = jnp.maximum(_bn_train(y, g_ref[...], be_ref[...]), 0.0)


def tail_kernel(*refs, proj_shortcut):
    # Fused: conv3x3 (single matmul over tap-concatenated channels) + BN + ReLU
    #        -> conv1x1 expansion + BN -> shortcut conv1x1 + BN -> add -> ReLU.
    if proj_shortcut:
        (p_ref, xs_ref, w2_ref, w3_ref, ws_ref,
         g2_ref, be2_ref, g3_ref, be3_ref, gs_ref, bes_ref, o_ref) = refs
    else:
        (p_ref, xs_ref, w2_ref, w3_ref,
         g2_ref, be2_ref, g3_ref, be3_ref, o_ref) = refs

    # conv2: 3x3 conv as ONE MXU matmul, K = 9 * C1.
    y2 = jnp.dot(p_ref[...], w2_ref[...], preferred_element_type=jnp.float32)
    y2 = jnp.maximum(_bn_train(y2, g2_ref[...], be2_ref[...]), 0.0)

    # conv3: 1x1 expansion + BN (stays in vregs/VMEM, no HBM round trip).
    y3 = _bn_train(
        jnp.dot(y2, w3_ref[...], preferred_element_type=jnp.float32),
        g3_ref[...], be3_ref[...])

    # shortcut branch.
    if proj_shortcut:
        sc = _bn_train(
            jnp.dot(xs_ref[...], ws_ref[...],
                    preferred_element_type=jnp.float32),
            gs_ref[...], bes_ref[...])
    else:
        sc = xs_ref[...]

    o_ref[...] = jnp.maximum(y3 + sc, 0.0)


def _vmem_call(kernel, args, out_shape):
    # Demo-scale problem: whole arrays live in VMEM, single invocation.
    return pl.pallas_call(
        kernel,
        out_shape=out_shape,
        in_specs=[pl.BlockSpec(memory_space=pltpu.MemorySpace.VMEM)
                  for _ in args],
        out_specs=pl.BlockSpec(memory_space=pltpu.MemorySpace.VMEM),
        compiler_params=pltpu.CompilerParams(
            vmem_limit_bytes=32 * 1024 * 1024),
    )(*args)


# ------------------------------- parameters --------------------------------

def init_params(key, in_c, out_c):
    c4 = out_c * EXPANSION
    ks = jax.random.split(key, 8)

    def u(k, shape, fan_in):
        bound = 1.0 / jnp.sqrt(float(fan_in))
        return jax.random.uniform(k, shape, jnp.float32, -bound, bound)

    return {
        # conv1: 1x1, in_c -> out_c          (stored as (Cin, Cout))
        "w1": u(ks[0], (in_c, out_c), in_c),
        "b1": u(ks[1], (1, out_c), in_c),
        "g1": jnp.ones((1, out_c), jnp.float32),
        "be1": jnp.zeros((1, out_c), jnp.float32),
        # conv2: 3x3, out_c -> out_c         (stored as (ky, kx, Cin, Cout))
        "w2": u(ks[2], (3, 3, out_c, out_c), out_c * 9),
        "b2": u(ks[3], (1, out_c), out_c * 9),
        "g2": jnp.ones((1, out_c), jnp.float32),
        "be2": jnp.zeros((1, out_c), jnp.float32),
        # conv3: 1x1, out_c -> out_c*4
        "w3": u(ks[4], (out_c, c4), out_c),
        "b3": u(ks[5], (1, c4), out_c),
        "g3": jnp.ones((1, c4), jnp.float32),
        "be3": jnp.zeros((1, c4), jnp.float32),
        # shortcut: 1x1 stride conv, in_c -> out_c*4
        "ws": u(ks[6], (in_c, c4), in_c),
        "bs": u(ks[7], (1, c4), in_c),
        "gs": jnp.ones((1, c4), jnp.float32),
        "bes": jnp.zeros((1, c4), jnp.float32),
    }


# ------------------------------- forward -----------------------------------

def bottleneck_forward(x_nchw, params, stride):
    N, Cin, H, W = x_nchw.shape
    C1 = params["w1"].shape[1]
    C4 = params["w3"].shape[1]
    s = stride
    Hout = (H - 1) // s + 1
    Wout = (W - 1) // s + 1
    M0 = N * H * W
    M1 = N * Hout * Wout

    x = jnp.transpose(x_nchw, (0, 2, 3, 1)).astype(jnp.float32)  # NCHW -> NHWC
    x_flat = x.reshape(M0, Cin)

    # Stage A: conv1x1 + BN + ReLU (one fused call).
    y1 = _vmem_call(
        conv1_bn_relu_kernel,
        (x_flat, params["w1"], params["g1"], params["be1"]),
        jax.ShapeDtypeStruct((M0, C1), jnp.float32))

    # im2col for the 3x3 stride-s conv: taps concatenated along the channel
    # axis so the kernel performs a single (M1, 9*C1) @ (9*C1, C1) matmul.
    y1_nhwc = y1.reshape(N, H, W, C1)
    y1p = jnp.pad(y1_nhwc, ((0, 0), (1, 1), (1, 1), (0, 0)))
    taps = [
        y1p[:, dy:dy + Hout * s:s, dx:dx + Wout * s:s, :].reshape(M1, C1)
        for dy in range(3) for dx in range(3)
    ]
    patches = jnp.concatenate(taps, axis=1)        # (M1, 9*C1)
    w2_flat = params["w2"].reshape(9 * C1, C1)     # rows ordered (ky, kx, ci)

    proj = (s != 1) or (Cin != C4)
    if proj:
        xs = x[:, ::s, ::s, :].reshape(M1, Cin)
        args = (patches, xs, w2_flat, params["w3"], params["ws"],
                params["g2"], params["be2"], params["g3"], params["be3"],
                params["gs"], params["bes"])
    else:
        xs = x_flat  # identity shortcut: already (M1, C4)
        args = (patches, xs, w2_flat, params["w3"],
                params["g2"], params["be2"], params["g3"], params["be3"])

    # Stage B: conv3x3+BN+ReLU -> conv1x1+BN -> shortcut+BN -> add -> ReLU.
    out = _vmem_call(
        functools.partial(tail_kernel, proj_shortcut=proj),
        args,
        jax.ShapeDtypeStruct((M1, C4), jnp.float32))

    out = out.reshape(N, Hout, Wout, C4)
    return jnp.transpose(out, (0, 3, 1, 2))  # NHWC -> NCHW


# --------------------------- pure-JAX reference -----------------------------

def reference_forward(x_nchw, params, stride):
    x = jnp.transpose(x_nchw, (0, 2, 3, 1))

    def conv(h, w, b, st, pad):
        y = jax.lax.conv_general_dilated(
            h, w, (st, st), [(pad, pad), (pad, pad)],
            dimension_numbers=("NHWC", "HWIO", "NHWC"))
        return y + b.reshape(1, 1, 1, -1)

    def bn(y, g, be):
        mu = jnp.mean(y, axis=(0, 1, 2), keepdims=True)
        var = jnp.mean((y - mu) ** 2, axis=(0, 1, 2), keepdims=True)
        return ((y - mu) * jax.lax.rsqrt(var + EPS) * g.reshape(1, 1, 1, -1)
                + be.reshape(1, 1, 1, -1))

    w1 = params["w1"].reshape(1, 1, *params["w1"].shape)
    w3 = params["w3"].reshape(1, 1, *params["w3"].shape)
    ws = params["ws"].reshape(1, 1, *params["ws"].shape)

    r = jax.nn.relu(bn(conv(x, w1, params["b1"], 1, 0),
                       params["g1"], params["be1"]))
    r = jax.nn.relu(bn(conv(r, params["w2"], params["b2"], stride, 1),
                       params["g2"], params["be2"]))
    r = bn(conv(r, w3, params["b3"], 1, 0), params["g3"], params["be3"])
    sc = bn(conv(x, ws, params["bs"], stride, 0),
            params["gs"], params["bes"])
    return jnp.transpose(jax.nn.relu(r + sc), (0, 3, 1, 2))


# ---------------------------------- main ------------------------------------

if __name__ == "__main__":
    key = jax.random.PRNGKey(0)
    k_x, k_p = jax.random.split(key)

    N, IN_C, H, W = 2, 4, 16, 16
    OUT_C = 4
    STRIDE = 2

    x = jax.random.normal(k_x, (N, IN_C, H, W), jnp.float32)
    params = init_params(k_p, IN_C, OUT_C)

    out = bottleneck_forward(x, params, STRIDE)
    out = jax.block_until_ready(out)

    ref = jax.block_until_ready(reference_forward(x, params, STRIDE))
    assert out.shape == (N, OUT_C * EXPANSION, H // STRIDE, W // STRIDE), out.shape
    assert jnp.allclose(out, ref, atol=2e-4, rtol=2e-4), \
        float(jnp.max(jnp.abs(out - ref)))

    print("KERNEL_OK")
</pallas_src>

<mosaic_0001>
module attributes {stable_mosaic.version = 11 : i64} {
  func.func @conv1_bn_relu_kernel(%arg0: memref<512x4xf32, #tpu.memory_space<vmem>>, %arg1: memref<4x4xf32, #tpu.memory_space<vmem>>, %arg2: memref<1x4xf32, #tpu.memory_space<vmem>>, %arg3: memref<1x4xf32, #tpu.memory_space<vmem>>, %arg4: memref<512x4xf32, #tpu.memory_space<vmem>>) attributes {dimension_semantics = [], scalar_prefetch = 0 : i64, scratch_operands = 0 : i64, tpu.core_type = #tpu.core_type<tc>} {
    %c0 = arith.constant 0 : index
    %c0_0 = arith.constant 0 : index
    %0 = vector.load %arg0[%c0, %c0_0] : memref<512x4xf32, #tpu.memory_space<vmem>>, vector<512x4xf32>
    %c0_1 = arith.constant 0 : index
    %c0_2 = arith.constant 0 : index
    %1 = vector.load %arg1[%c0_1, %c0_2] : memref<4x4xf32, #tpu.memory_space<vmem>>, vector<4x4xf32>
    %cst = arith.constant dense<0.000000e+00> : vector<512x4xf32>
    %2 = tpu.matmul %0, %1, %cst {dimension_numbers = #tpu.dot_dimension_numbers<[1], [0], [0], [1], [0, 0, 1, 1], [], []>} : vector<512x4xf32>, vector<4x4xf32>, vector<512x4xf32> -> vector<512x4xf32>
    %c0_3 = arith.constant 0 : index
    %c0_4 = arith.constant 0 : index
    %3 = vector.load %arg2[%c0_3, %c0_4] : memref<1x4xf32, #tpu.memory_space<vmem>>, vector<1x4xf32>
    %c0_5 = arith.constant 0 : index
    %c0_6 = arith.constant 0 : index
    %4 = vector.load %arg3[%c0_5, %c0_6] : memref<1x4xf32, #tpu.memory_space<vmem>>, vector<1x4xf32>
    %cst_7 = arith.constant dense<0.000000e+00> : vector<4xf32>
    %5 = vector.multi_reduction <add>, %2, %cst_7 [0] : vector<512x4xf32> to vector<4xf32>
    %6 = vector.shape_cast %5 : vector<4xf32> to vector<1x4xf32>
    %cst_8 = arith.constant 0.001953125 : f32
    %7 = vector.broadcast %cst_8 : f32 to vector<1x4xf32>
    %8 = arith.mulf %6, %7 : vector<1x4xf32>
    %9 = arith.mulf %2, %2 : vector<512x4xf32>
    %cst_9 = arith.constant dense<0.000000e+00> : vector<4xf32>
    %10 = vector.multi_reduction <add>, %9, %cst_9 [0] : vector<512x4xf32> to vector<4xf32>
    %11 = vector.shape_cast %10 : vector<4xf32> to vector<1x4xf32>
    %cst_10 = arith.constant 0.001953125 : f32
    %12 = vector.broadcast %cst_10 : f32 to vector<1x4xf32>
    %13 = arith.mulf %11, %12 : vector<1x4xf32>
    %14 = arith.mulf %8, %8 : vector<1x4xf32>
    %15 = arith.subf %13, %14 : vector<1x4xf32>
    %cst_11 = arith.constant 9.99999974E-6 : f32
    %16 = vector.broadcast %cst_11 : f32 to vector<1x4xf32>
    %17 = arith.addf %15, %16 : vector<1x4xf32>
    %18 = math.rsqrt %17 : vector<1x4xf32>
    %19 = arith.mulf %3, %18 : vector<1x4xf32>
    %20 = vector.broadcast %8 : vector<1x4xf32> to vector<512x4xf32>
    %21 = arith.subf %2, %20 : vector<512x4xf32>
    %22 = vector.broadcast %19 : vector<1x4xf32> to vector<512x4xf32>
    %23 = arith.mulf %21, %22 : vector<512x4xf32>
    %24 = vector.broadcast %4 : vector<1x4xf32> to vector<512x4xf32>
    %25 = arith.addf %23, %24 : vector<512x4xf32>
    %cst_12 = arith.constant 0.000000e+00 : f32
    %26 = vector.broadcast %cst_12 : f32 to vector<512x4xf32>
    %27 = arith.maximumf %25, %26 : vector<512x4xf32>
    %c0_13 = arith.constant 0 : index
    %c0_14 = arith.constant 0 : index
    %28 = vector.load %arg4[%c0_13, %c0_14] : memref<512x4xf32, #tpu.memory_space<vmem>>, vector<512x4xf32>
    tpu.vector_store %arg4[%c0_13, %c0_14], %27 {strides = array<i32>} : memref<512x4xf32, #tpu.memory_space<vmem>>, vector<512x4xf32>,
    return
  }
}

</mosaic_0001>

<bundles_post_ra>
// kernel: tpu_custom_call.1
= control target key start
LH: loop header
LB: loop body
LE: loop exit
PB: predicated region body
PF: predicated region fallthrough
CT: control target
= control target key end

     0   :  { %vm275_vm0 = vcmask 1043456   ;;  %vm82_vm1 = vcmask 31744   ;;  %s3411_s1 = inlined_call_operand.vmem [shape: f32[4,4], index: 1, kind: input, shape index: {}]   ;;  %s3412_s0 = inlined_call_operand.vmem [shape: f32[512,4], index: 0, kind: input, shape index: {}]   ;;  %s3413_s2 = inlined_call_operand.vmem [shape: f32[1,4], index: 2, kind: input, shape index: {}]   ;;  %s3414_s3 = inlined_call_operand.vmem [shape: f32[1,4], index: 3, kind: input, shape index: {}]   ;;  %s3415_s4 = inlined_call_operand.vmem [shape: f32[512,4], index: 4, kind: output, shape index: {}]  }
   0x1   :  { %v81_v0 = vld [vmem:[%s3411_s1] sm:$0xf]  ;;  %v18_v2 = vld [vmem:[%s3412_s0 + $0x8] sm:$0xff]  ;;  %v19_v3 = vld [vmem:[%s3412_s0 + $0x10] sm:$0xff] }
   0x2   :  { %v17_v1 = vld [vmem:[%s3412_s0] sm:$0xff]  ;;  %1470 = vmatprep.subr.msk.mxu0 %vm275_vm0, %v81_v0  ;;  %1568 = vmatprep.subr.msk.mxu1 %vm275_vm0, %v81_v0  ;;  %v20_v4 = vld [vmem:[%s3412_s0 + $0x18] sm:$0xff]  ;;  %v22_v6 = vld [vmem:[%s3412_s0 + $0x28] sm:$0xff] }
   0x3   :  { %1472 = vmatprep.mubr.msk.f32.mxu0 %vm82_vm1, %v17_v1  ;;  %1471 = vmatpush3.msk.msra.mxu0 %vm275_vm0, %v81_v0  ;;  %v21_v5 = vld [vmem:[%s3412_s0 + $0x20] sm:$0xff]  ;;  %v23_v7 = vld [vmem:[%s3412_s0 + $0x30] sm:$0xff]  ;;  %v50_v9 = vld [vmem:[%s3412_s0 + $0x108] sm:$0xff] }
   0x4   :  { %1473 = vmatmul.mubr.msk.f32.vlgmr.msra.gmra.mrb[0].mxu0 %vm82_vm1, %v18_v2  ;;  %1569 = vmatpush3.msk.msra.mxu1 %vm275_vm0, %v81_v0  ;;  %v49_v8 = vld [vmem:[%s3412_s0 + $0x100] sm:$0xff]  ;;  %v51_v10 = vld [vmem:[%s3412_s0 + $0x110] sm:$0xff]  ;;  %v24_v11 = vld [vmem:[%s3412_s0 + $0x38] sm:$0xff] }
   0x5   :  { %1475 = vmatprep.mubr.msk.f32.mxu0 %vm82_vm1, %v19_v3  ;;  %1520 = vmatprep.mubr.msk.f32.mxu1 %vm82_vm1, %v49_v8  ;;  %v25_v12 = vld [vmem:[%s3412_s0 + $0x40] sm:$0xff]  ;;  %v52_v13 = vld [vmem:[%s3412_s0 + $0x118] sm:$0xff]  ;;  %v26_v15 = vld [vmem:[%s3412_s0 + $0x48] sm:$0xff] }
   0x6   :  { %1521 = vmatmul.mubr.msk.f32.vlgmr.msra.gmra.mrb[0].mxu1 %vm82_vm1, %v50_v9  ;;  %v53_v14 = vld [vmem:[%s3412_s0 + $0x120] sm:$0xff]  ;;  %v27_v16 = vld [vmem:[%s3412_s0 + $0x50] sm:$0xff]  ;;  %v54_v17 = vld [vmem:[%s3412_s0 + $0x128] sm:$0xff] }
   0x7   :  { %1523 = vmatprep.mubr.msk.f32.mxu1 %vm82_vm1, %v51_v10  ;;  %v55_v18 = vld [vmem:[%s3412_s0 + $0x130] sm:$0xff]  ;;  %v28_v19 = vld [vmem:[%s3412_s0 + $0x58] sm:$0xff]  ;;  %v29_v20 = vld [vmem:[%s3412_s0 + $0x60] sm:$0xff] }
   0x8   :  { %1476 = vmatmul.mubr.msk.f32.gmra.mrb[2].mxu0 %vm82_vm1, %v20_v4  ;;  %v56_v21 = vld [vmem:[%s3412_s0 + $0x138] sm:$0xff]  ;;  %v57_v22 = vld [vmem:[%s3412_s0 + $0x140] sm:$0xff]  ;;  %v30_v23 = vld [vmem:[%s3412_s0 + $0x68] sm:$0xff] }
   0x9   :  { %1478 = vmatprep.mubr.msk.f32.mxu0 %vm82_vm1, %v21_v5  ;;  %v31_v24 = vld [vmem:[%s3412_s0 + $0x70] sm:$0xff]  ;;  %v58_v25 = vld [vmem:[%s3412_s0 + $0x148] sm:$0xff]  ;;  %v32_v27 = vld [vmem:[%s3412_s0 + $0x78] sm:$0xff] }
   0xa   :  { %1524 = vmatmul.mubr.msk.f32.gmra.mrb[2].mxu1 %vm82_vm1, %v52_v13  ;;  %v59_v26 = vld [vmem:[%s3412_s0 + $0x150] sm:$0xff]  ;;  %v33_v28 = vld [vmem:[%s3412_s0 + $0x80] sm:$0xff]  ;;  %v60_v29 = vld [vmem:[%s3412_s0 + $0x158] sm:$0xff] }
   0xb   :  { %1526 = vmatprep.mubr.msk.f32.mxu1 %vm82_vm1, %v53_v14  ;;  %v61_v30 = vld [vmem:[%s3412_s0 + $0x160] sm:$0xff]  ;;  %v34_v31 = vld [vmem:[%s3412_s0 + $0x88] sm:$0xff]  ;;  %v35_v32 = vld [vmem:[%s3412_s0 + $0x90] sm:$0xff] }
   0xc   :  { %1479 = vmatmul.mubr.msk.f32.gmra.mrb[4].mxu0 %vm82_vm1, %v22_v6  ;;  %v62_v33 = vld [vmem:[%s3412_s0 + $0x168] sm:$0xff]  ;;  %v63_v34 = vld [vmem:[%s3412_s0 + $0x170] sm:$0xff]  ;;  %v36_v35 = vld [vmem:[%s3412_s0 + $0x98] sm:$0xff] }
   0xd   :  { %1481 = vmatprep.mubr.msk.f32.mxu0 %vm82_vm1, %v23_v7  ;;  %v37_v36 = vld [vmem:[%s3412_s0 + $0xa0] sm:$0xff]  ;;  %v64_v37 = vld [vmem:[%s3412_s0 + $0x178] sm:$0xff]  ;;  %v38_v39 = vld [vmem:[%s3412_s0 + $0xa8] sm:$0xff] }
   0xe   :  { %1527 = vmatmul.mubr.msk.f32.gmra.mrb[4].mxu1 %vm82_vm1, %v54_v17  ;;  %v65_v38 = vld [vmem:[%s3412_s0 + $0x180] sm:$0xff]  ;;  %v39_v40 = vld [vmem:[%s3412_s0 + $0xb0] sm:$0xff]  ;;  %v66_v41 = vld [vmem:[%s3412_s0 + $0x188] sm:$0xff] }
   0xf   :  { %1529 = vmatprep.mubr.msk.f32.mxu1 %vm82_vm1, %v55_v18  ;;  %v67_v42 = vld [vmem:[%s3412_s0 + $0x190] sm:$0xff]  ;;  %v40_v43 = vld [vmem:[%s3412_s0 + $0xb8] sm:$0xff]  ;;  %v41_v44 = vld [vmem:[%s3412_s0 + $0xc0] sm:$0xff] }
  0x10   :  { %1482 = vmatmul.mubr.msk.f32.gmra.mrb[6].mxu0 %vm82_vm1, %v24_v11  ;;  %v68_v45 = vld [vmem:[%s3412_s0 + $0x198] sm:$0xff]  ;;  %v69_v46 = vld [vmem:[%s3412_s0 + $0x1a0] sm:$0xff]  ;;  %v42_v47 = vld [vmem:[%s3412_s0 + $0xc8] sm:$0xff] }
  0x11   :  { %1484 = vmatprep.mubr.msk.f32.mxu0 %vm82_vm1, %v25_v12  ;;  %v43_v48 = vld [vmem:[%s3412_s0 + $0xd0] sm:$0xff]  ;;  %v70_v49 = vld [vmem:[%s3412_s0 + $0x1a8] sm:$0xff]  ;;  %v44_v51 = vld [vmem:[%s3412_s0 + $0xd8] sm:$0xff] }
  0x12   :  { %1530 = vmatmul.mubr.msk.f32.gmra.mrb[6].mxu1 %vm82_vm1, %v56_v21  ;;  %v71_v50 = vld [vmem:[%s3412_s0 + $0x1b0] sm:$0xff]  ;;  %v45_v52 = vld [vmem:[%s3412_s0 + $0xe0] sm:$0xff]  ;;  %v72_v53 = vld [vmem:[%s3412_s0 + $0x1b8] sm:$0xff] }
  0x13   :  { %1532 = vmatprep.mubr.msk.f32.mxu1 %vm82_vm1, %v57_v22  ;;  %v73_v54 = vld [vmem:[%s3412_s0 + $0x1c0] sm:$0xff]  ;;  %v46_v55 = vld [vmem:[%s3412_s0 + $0xe8] sm:$0xff]  ;;  %v47_v56 = vld [vmem:[%s3412_s0 + $0xf0] sm:$0xff] }
  0x14   :  { %1485 = vmatmul.mubr.msk.f32.gmra.mrb[8].mxu0 %vm82_vm1, %v26_v15  ;;  %v74_v57 = vld [vmem:[%s3412_s0 + $0x1c8] sm:$0xff]  ;;  %v75_v58 = vld [vmem:[%s3412_s0 + $0x1d0] sm:$0xff]  ;;  %v48_v59 = vld [vmem:[%s3412_s0 + $0xf8] sm:$0xff] }
  0x15   :  { %1487 = vmatprep.mubr.msk.f32.mxu0 %vm82_vm1, %v27_v16  ;;  %v76_v60 = vld [vmem:[%s3412_s0 + $0x1d8] sm:$0xff]  ;;  %v77_v61 = vld [vmem:[%s3412_s0 + $0x1e0] sm:$0xff]  ;;  %v78_v62 = vld [vmem:[%s3412_s0 + $0x1e8] sm:$0xff] }
  0x16   :  { %1533 = vmatmul.mubr.msk.f32.gmra.mrb[8].mxu1 %vm82_vm1, %v58_v25  ;;  %v79_v63 = vld [vmem:[%s3412_s0 + $0x1f0] sm:$0xff]  ;;  %v80_v0 = vld [vmem:[%s3412_s0 + $0x1f8] sm:$0xff] }
  0x17   :  { %1535 = vmatprep.mubr.msk.f32.mxu1 %vm82_vm1, %v59_v26 }
  0x18   :  { %1488 = vmatmul.mubr.msk.f32.gmra.mrb[10].mxu0 %vm82_vm1, %v28_v19 }
  0x19   :  { %1490 = vmatprep.mubr.msk.f32.mxu0 %vm82_vm1, %v29_v20 }
  0x1a   :  { %1536 = vmatmul.mubr.msk.f32.gmra.mrb[10].mxu1 %vm82_vm1, %v60_v29 }
  0x1b   :  { %1538 = vmatprep.mubr.msk.f32.mxu1 %vm82_vm1, %v61_v30 }
  0x1c   :  { %1491 = vmatmul.mubr.msk.f32.gmra.mrb[12].mxu0 %vm82_vm1, %v30_v23 }
  0x1d   :  { %1493 = vmatprep.mubr.msk.f32.mxu0 %vm82_vm1, %v31_v24 }
  0x1e   :  { %1539 = vmatmul.mubr.msk.f32.gmra.mrb[12].mxu1 %vm82_vm1, %v62_v33 }
  0x1f   :  { %1541 = vmatprep.mubr.msk.f32.mxu1 %vm82_vm1, %v63_v34 }
  0x20   :  { %1494 = vmatmul.mubr.msk.f32.gmra.mrb[14].mxu0 %vm82_vm1, %v32_v27 }
  0x21   :  { %1496 = vmatprep.mubr.msk.f32.mxu0 %vm82_vm1, %v33_v28 }
  0x22   :  { %1542 = vmatmul.mubr.msk.f32.gmra.mrb[14].mxu1 %vm82_vm1, %v64_v37 }
  0x23   :  { %1544 = vmatprep.mubr.msk.f32.mxu1 %vm82_vm1, %v65_v38 }
  0x24   :  { %1497 = vmatmul.mubr.msk.f32.gmra.mrb[16].mxu0 %vm82_vm1, %v34_v31 }
  0x25   :  { %1499 = vmatprep.mubr.msk.f32.mxu0 %vm82_vm1, %v35_v32 }
  0x26   :  { %1545 = vmatmul.mubr.msk.f32.gmra.mrb[16].mxu1 %vm82_vm1, %v66_v41 }
  0x27   :  { %1547 = vmatprep.mubr.msk.f32.mxu1 %vm82_vm1, %v67_v42 }
  0x28   :  { %1500 = vmatmul.mubr.msk.f32.gmra.mrb[18].mxu0 %vm82_vm1, %v36_v35 }
  0x29   :  { %1502 = vmatprep.mubr.msk.f32.mxu0 %vm82_vm1, %v37_v36 }
  0x2a   :  { %1548 = vmatmul.mubr.msk.f32.gmra.mrb[18].mxu1 %vm82_vm1, %v68_v45 }
  0x2b   :  { %1550 = vmatprep.mubr.msk.f32.mxu1 %vm82_vm1, %v69_v46 }
  0x2c   :  { %1503 = vmatmul.mubr.msk.f32.gmra.mrb[20].mxu0 %vm82_vm1, %v38_v39 }
  0x2d   :  { %1505 = vmatprep.mubr.msk.f32.mxu0 %vm82_vm1, %v39_v40 }
  0x2e   :  { %1551 = vmatmul.mubr.msk.f32.gmra.mrb[20].mxu1 %vm82_vm1, %v70_v49 }
  0x2f   :  { %1553 = vmatprep.mubr.msk.f32.mxu1 %vm82_vm1, %v71_v50 }
  0x30   :  { %1506 = vmatmul.mubr.msk.f32.gmra.mrb[22].mxu0 %vm82_vm1, %v40_v43 }
  0x31   :  { %1508 = vmatprep.mubr.msk.f32.mxu0 %vm82_vm1, %v41_v44 }
  0x32   :  { %1554 = vmatmul.mubr.msk.f32.gmra.mrb[22].mxu1 %vm82_vm1, %v72_v53 }
  0x33   :  { %1556 = vmatprep.mubr.msk.f32.mxu1 %vm82_vm1, %v73_v54 }
  0x34   :  { %1509 = vmatmul.mubr.msk.f32.gmra.mrb[24].mxu0 %vm82_vm1, %v42_v47 }
  0x35   :  { %1511 = vmatprep.mubr.msk.f32.mxu0 %vm82_vm1, %v43_v48 }
  0x36   :  { %1557 = vmatmul.mubr.msk.f32.gmra.mrb[24].mxu1 %vm82_vm1, %v74_v57 }
  0x37   :  { %1559 = vmatprep.mubr.msk.f32.mxu1 %vm82_vm1, %v75_v58 }
  0x38   :  { %1512 = vmatmul.mubr.msk.f32.gmra.mrb[26].mxu0 %vm82_vm1, %v44_v51 }
  0x39   :  { %1514 = vmatprep.mubr.msk.f32.mxu0 %vm82_vm1, %v45_v52 }
  0x3a   :  { %1560 = vmatmul.mubr.msk.f32.gmra.mrb[26].mxu1 %vm82_vm1, %v76_v60 }
  0x3b   :  { %1562 = vmatprep.mubr.msk.f32.mxu1 %vm82_vm1, %v77_v61 }
  0x3c   :  { %1515 = vmatmul.mubr.msk.f32.gmra.mrb[28].mxu0 %vm82_vm1, %v46_v55 }
  0x3d   :  { %1517 = vmatprep.mubr.msk.f32.mxu0 %vm82_vm1, %v47_v56 }
  0x3e   :  { %1563 = vmatmul.mubr.msk.f32.gmra.mrb[28].mxu1 %vm82_vm1, %v78_v62 }
  0x3f   :  { %1565 = vmatprep.mubr.msk.f32.mxu1 %vm82_vm1, %v79_v63 }
  0x40   :  { %1518 = vmatmul.mubr.msk.f32.gmra.mrb[30].mxu0 %vm82_vm1, %v48_v59 }
  0x42   :  { %1566 = vmatmul.mubr.msk.f32.gmra.mrb[30].mxu1 %vm82_vm1, %v80_v0 }
  0xd7   :  { %v1856_v1 = vpop.f32.mrb[0].mxu0 }
  0xd8   :  { %v667_v2 = vsel %vm82_vm1, %v1856_v1, 0.0  ;;  %v801_v3 = vmul.f32 %v1856_v1, %v1856_v1  ;;  %v1862_v4 = vpop.f32.mrb[1].mxu0 }
  0xd9   :  { %v666_v5 = vsel %vm82_vm1, %v1862_v4, 0.0  ;;  %v800_v6 = vmul.f32 %v1862_v4, %v1862_v4  ;;  %v1894_v27 = vpop.f32.mrb[0].mxu1 }
  0xda   :  { %v865_v7 = vsel %vm82_vm1, %v801_v3, 0.0  ;;  %v668_v8 = vadd.f32 %v667_v2, %v666_v5  ;;  %3470 = vst [vmem:[#allocation2_spill] sm:$0xff] %v1894_v27  ;;  %v1896_v30 = vpop.f32.mrb[1].mxu1 }
  0xdb   :  { %v864_v9 = vsel %vm82_vm1, %v800_v6, 0.0  ;;  %v1870_v10 = vpop.f32.mrb[2].mxu0  ;;  %3471 = vst [vmem:[#allocation3_spill] sm:$0xff] %v1896_v30 }
  0xdc   :  { %v866_v11 = vadd.f32 %v865_v7, %v864_v9  ;;  %v1872_v12 = vpop.f32.mrb[3].mxu0  ;;  %v803_v13 = vmul.f32 %v1870_v10, %v1870_v10  ;;  %v671_v17 = vsel %vm82_vm1, %v1870_v10, 0.0 }
  0xdd   :  { %v669_v14 = vsel %vm82_vm1, %v1872_v12, 0.0  ;;  %v802_v15 = vmul.f32 %v1872_v12, %v1872_v12  ;;  %v1912_v41 = vpop.f32.mrb[2].mxu1 }
  0xde   :  { %v670_v16 = vadd.f32 %v669_v14, %v668_v8  ;;  %v869_v23 = vsel %vm82_vm1, %v803_v13, 0.0  ;;  %v1914_v44 = vpop.f32.mrb[3].mxu1 }
  0xdf   :  { %v867_v18 = vsel %vm82_vm1, %v802_v15, 0.0  ;;  %v1883_v19 = vpop.f32.mrb[4].mxu0  ;;  %3472 = vst [vmem:[#allocation4_spill] sm:$0xff] %v1914_v44 }
  0xe0   :  { %v868_v20 = vadd.f32 %v867_v18, %v866_v11  ;;  %v1885_v21 = vpop.f32.mrb[5].mxu0  ;;  %v672_v22 = vadd.f32 %v671_v17, %v670_v16  ;;  %v805_v24 = vmul.f32 %v1883_v19, %v1883_v19  ;;  %v675_v31 = vsel %vm82_vm1, %v1883_v19, 0.0 }
  0xe1   :  { %v673_v25 = vsel %vm82_vm1, %v1885_v21, 0.0  ;;  %v804_v26 = vmul.f32 %v1885_v21, %v1885_v21  ;;  %v1930_v55 = vpop.f32.mrb[4].mxu1 }
  0xe2   :  { %v674_v28 = vadd.f32 %v673_v25, %v672_v22  ;;  %v870_v29 = vadd.f32 %v869_v23, %v868_v20  ;;  %v873_v37 = vsel %vm82_vm1, %v805_v24, 0.0  ;;  %v1932_v58 = vpop.f32.mrb[5].mxu1 }
  0xe3   :  { %v871_v32 = vsel %vm82_vm1, %v804_v26, 0.0  ;;  %v1901_v33 = vpop.f32.mrb[6].mxu0  ;;  %3473 = vst [vmem:[#allocation5_spill] sm:$0xff] %v1932_v58 }
  0xe4   :  { %v872_v34 = vadd.f32 %v871_v32, %v870_v29  ;;  %v1903_v35 = vpop.f32.mrb[7].mxu0  ;;  %v676_v36 = vadd.f32 %v675_v31, %v674_v28  ;;  %v807_v38 = vmul.f32 %v1901_v33, %v1901_v33  ;;  %v679_v45 = vsel %vm82_vm1, %v1901_v33, 0.0 }
  0xe5   :  { %v677_v39 = vsel %vm82_vm1, %v1903_v35, 0.0  ;;  %v806_v40 = vmul.f32 %v1903_v35, %v1903_v35  ;;  %v1948_v7 = vpop.f32.mrb[6].mxu1 }
  0xe6   :  { %v678_v42 = vadd.f32 %v677_v39, %v676_v36  ;;  %v874_v43 = vadd.f32 %v873_v37, %v872_v34  ;;  %v877_v51 = vsel %vm82_vm1, %v807_v38, 0.0  ;;  %v1950_v11 = vpop.f32.mrb[7].mxu1 }
  0xe7   :  { %v875_v46 = vsel %vm82_vm1, %v806_v40, 0.0  ;;  %v1919_v47 = vpop.f32.mrb[8].mxu0 }
  0xe8   :  { %v876_v48 = vadd.f32 %v875_v46, %v874_v43  ;;  %v1921_v49 = vpop.f32.mrb[9].mxu0  ;;  %v680_v50 = vadd.f32 %v679_v45, %v678_v42  ;;  %v809_v52 = vmul.f32 %v1919_v47, %v1919_v47  ;;  %v683_v59 = vsel %vm82_vm1, %v1919_v47, 0.0 }
  0xe9   :  { %v681_v53 = vsel %vm82_vm1, %v1921_v49, 0.0  ;;  %v808_v54 = vmul.f32 %v1921_v49, %v1921_v49  ;;  %v1966_v25 = vpop.f32.mrb[8].mxu1 }
  0xea   :  { %v682_v56 = vadd.f32 %v681_v53, %v680_v50  ;;  %v878_v57 = vadd.f32 %v877_v51, %v876_v48  ;;  %v881_v2 = vsel %vm82_vm1, %v809_v52, 0.0  ;;  %v1968_v29 = vpop.f32.mrb[9].mxu1 }
  0xeb   :  { %v879_v60 = vsel %vm82_vm1, %v808_v54, 0.0  ;;  %v1937_v61 = vpop.f32.mrb[10].mxu0 }
  0xec   :  { %v880_v62 = vadd.f32 %v879_v60, %v878_v57  ;;  %v1939_v63 = vpop.f32.mrb[11].mxu0  ;;  %v684_v0 = vadd.f32 %v683_v59, %v682_v56  ;;  %v811_v3 = vmul.f32 %v1937_v61, %v1937_v61  ;;  %v687_v13 = vsel %vm82_vm1, %v1937_v61, 0.0 }
  0xed   :  { %v685_v5 = vsel %vm82_vm1, %v1939_v63, 0.0  ;;  %v810_v6 = vmul.f32 %v1939_v63, %v1939_v63  ;;  %v1984_v45 = vpop.f32.mrb[10].mxu1 }
  0xee   :  { %v686_v8 = vadd.f32 %v685_v5, %v684_v0  ;;  %v882_v9 = vadd.f32 %v881_v2, %v880_v62  ;;  %v885_v20 = vsel %vm82_vm1, %v811_v3, 0.0  ;;  %v1986_v50 = vpop.f32.mrb[11].mxu1 }
  0xef   :  { %v883_v14 = vsel %vm82_vm1, %v810_v6, 0.0  ;;  %v1955_v15 = vpop.f32.mrb[12].mxu0 }
  0xf0   :  { %v884_v16 = vadd.f32 %v883_v14, %v882_v9  ;;  %v1957_v17 = vpop.f32.mrb[13].mxu0  ;;  %v688_v18 = vadd.f32 %v687_v13, %v686_v8  ;;  %v813_v22 = vmul.f32 %v1955_v15, %v1955_v15  ;;  %v691_v31 = vsel %vm82_vm1, %v1955_v15, 0.0 }
  0xf1   :  { %v689_v23 = vsel %vm82_vm1, %v1957_v17, 0.0  ;;  %v812_v24 = vmul.f32 %v1957_v17, %v1957_v17  ;;  %v2002_v2 = vpop.f32.mrb[12].mxu1 }
  0xf2   :  { %v690_v26 = vadd.f32 %v689_v23, %v688_v18  ;;  %v886_v28 = vadd.f32 %v885_v20, %v884_v16  ;;  %v889_v39 = vsel %vm82_vm1, %v813_v22, 0.0  ;;  %v2004_v6 = vpop.f32.mrb[13].mxu1 }
  0xf3   :  { %v887_v32 = vsel %vm82_vm1, %v812_v24, 0.0  ;;  %v1973_v34 = vpop.f32.mrb[14].mxu0 }
  0xf4   :  { %v888_v36 = vadd.f32 %v887_v32, %v886_v28  ;;  %v1975_v37 = vpop.f32.mrb[15].mxu0  ;;  %v692_v38 = vadd.f32 %v691_v31, %v690_v26  ;;  %v815_v40 = vmul.f32 %v1973_v34, %v1973_v34  ;;  %v695_v51 = vsel %vm82_vm1, %v1973_v34, 0.0 }
  0xf5   :  { %v693_v42 = vsel %vm82_vm1, %v1975_v37, 0.0  ;;  %v814_v43 = vmul.f32 %v1975_v37, %v1975_v37  ;;  %v2020_v26 = vpop.f32.mrb[14].mxu1 }
  0xf6   :  { %v694_v46 = vadd.f32 %v693_v42, %v692_v38  ;;  %v890_v48 = vadd.f32 %v889_v39, %v888_v36  ;;  %v893_v59 = vsel %vm82_vm1, %v815_v40, 0.0  ;;  %v2022_v32 = vpop.f32.mrb[15].mxu1 }
  0xf7   :  { %v891_v52 = vsel %vm82_vm1, %v814_v43, 0.0  ;;  %v1991_v53 = vpop.f32.mrb[16].mxu0 }
  0xf8   :  { %v892_v54 = vadd.f32 %v891_v52, %v890_v48  ;;  %v1993_v56 = vpop.f32.mrb[17].mxu0  ;;  %v696_v57 = vadd.f32 %v695_v51, %v694_v46  ;;  %v817_v60 = vmul.f32 %v1991_v53, %v1991_v53  ;;  %v699_v8 = vsel %vm82_vm1, %v1991_v53, 0.0 }
  0xf9   :  { %v697_v62 = vsel %vm82_vm1, %v1993_v56, 0.0  ;;  %v816_v0 = vmul.f32 %v1993_v56, %v1993_v56 }
  0xfa   :  { %v698_v3 = vadd.f32 %v697_v62, %v696_v57  ;;  %v894_v5 = vadd.f32 %v893_v59, %v892_v54  ;;  %v897_v20 = vsel %vm82_vm1, %v817_v60, 0.0  ;;  %v2038_v54 = vpop.f32.mrb[16].mxu1 }
  0xfb   :  { %v895_v9 = vsel %vm82_vm1, %v816_v0, 0.0  ;;  %v2009_v13 = vpop.f32.mrb[18].mxu0  ;;  %3477 = vst [vmem:[#allocation9_spill] sm:$0xff] %v2038_v54  ;;  %v2040_v60 = vpop.f32.mrb[17].mxu1 }
  0xfc   :  { %3474 = vst [vmem:[#allocation6_spill] sm:$0xff] %v2009_v13  ;;  %v896_v14 = vadd.f32 %v895_v9, %v894_v5  ;;  %v2011_v16 = vpop.f32.mrb[19].mxu0  ;;  %v700_v18 = vadd.f32 %v699_v8, %v698_v3  ;;  %v819_v22 = vmul.f32 %v2009_v13, %v2009_v13  ;;  %v703_v36 = vsel %vm82_vm1, %v2009_v13, 0.0  ;;  %3478 = vst [vmem:[#allocation10_spill] sm:$0xff] %v2040_v60 }
  0xfd   :  { %v701_v23 = vsel %vm82_vm1, %v2011_v16, 0.0  ;;  %v818_v24 = vmul.f32 %v2011_v16, %v2011_v16 }
  0xfe   :  { %v702_v28 = vadd.f32 %v701_v23, %v700_v18  ;;  %v898_v31 = vadd.f32 %v897_v20, %v896_v14  ;;  %v901_v46 = vsel %vm82_vm1, %v819_v22, 0.0  ;;  %v2056_v23 = vpop.f32.mrb[18].mxu1 }
  0xff   :  { %v899_v38 = vsel %vm82_vm1, %v818_v24, 0.0  ;;  %v2027_v39 = vpop.f32.mrb[20].mxu0  ;;  %3481 = vst [vmem:[#allocation13_spill] sm:$0xff] %v2056_v23 }
 0x100   :  { %3475 = vst [vmem:[#allocation7_spill] sm:$0xff] %v2027_v39  ;;  %v900_v40 = vadd.f32 %v899_v38, %v898_v31  ;;  %v2029_v42 = vpop.f32.mrb[21].mxu0  ;;  %v704_v43 = vadd.f32 %v703_v36, %v702_v28  ;;  %v821_v48 = vmul.f32 %v2027_v39, %v2027_v39  ;;  %v707_v62 = vsel %vm82_vm1, %v2027_v39, 0.0  ;;  %v2058_v31 = vpop.f32.mrb[19].mxu1 }
 0x101   :  { %3476 = vst [vmem:[#allocation8_spill] sm:$0xff] %v2029_v42  ;;  %v705_v51 = vsel %vm82_vm1, %v2029_v42, 0.0  ;;  %v820_v52 = vmul.f32 %v2029_v42, %v2029_v42  ;;  %3482 = vst [vmem:[#allocation14_spill] sm:$0xff] %v2058_v31 }
 0x102   :  { %v706_v57 = vadd.f32 %v705_v51, %v704_v43  ;;  %v902_v59 = vadd.f32 %v901_v46, %v900_v40  ;;  %v905_v14 = vsel %vm82_vm1, %v821_v48, 0.0 }
 0x103   :  { %v903_v0 = vsel %vm82_vm1, %v820_v52, 0.0  ;;  %v2045_v3 = vpop.f32.mrb[22].mxu0 }
 0x104   :  { %3479 = vst [vmem:[#allocation11_spill] sm:$0xff] %v2045_v3  ;;  %v904_v5 = vadd.f32 %v903_v0, %v902_v59  ;;  %v2047_v8 = vpop.f32.mrb[23].mxu0  ;;  %v708_v9 = vadd.f32 %v707_v62, %v706_v57  ;;  %v823_v18 = vmul.f32 %v2045_v3, %v2045_v3  ;;  %v711_v36 = vsel %vm82_vm1, %v2045_v3, 0.0  ;;  %v2074_v62 = vpop.f32.mrb[20].mxu1 }
 0x105   :  { %3480 = vst [vmem:[#allocation12_spill] sm:$0xff] %v2047_v8  ;;  %v709_v20 = vsel %vm82_vm1, %v2047_v8, 0.0  ;;  %v822_v22 = vmul.f32 %v2047_v8, %v2047_v8  ;;  %3485 = vst [vmem:[#allocation17_spill] sm:$0xff] %v2074_v62 }
 0x106   :  { %v710_v24 = vadd.f32 %v709_v20, %v708_v9  ;;  %v906_v28 = vadd.f32 %v905_v14, %v904_v5  ;;  %v909_v51 = vsel %vm82_vm1, %v823_v18, 0.0  ;;  %v2076_v9 = vpop.f32.mrb[21].mxu1 }
 0x107   :  { %v907_v38 = vsel %vm82_vm1, %v822_v22, 0.0  ;;  %v2063_v40 = vpop.f32.mrb[24].mxu0  ;;  %3486 = vst [vmem:[#allocation18_spill] sm:$0xff] %v2076_v9 }
 0x108   :  { %3483 = vst [vmem:[#allocation15_spill] sm:$0xff] %v2063_v40  ;;  %v908_v43 = vadd.f32 %v907_v38, %v906_v28  ;;  %v2065_v46 = vpop.f32.mrb[25].mxu0  ;;  %v712_v48 = vadd.f32 %v711_v36, %v710_v24  ;;  %v825_v52 = vmul.f32 %v2063_v40, %v2063_v40  ;;  %v715_v14 = vsel %vm82_vm1, %v2063_v40, 0.0 }
 0x109   :  { %3484 = vst [vmem:[#allocation16_spill] sm:$0xff] %v2065_v46  ;;  %v713_v57 = vsel %vm82_vm1, %v2065_v46, 0.0  ;;  %v824_v59 = vmul.f32 %v2065_v46, %v2065_v46 }
 0x10a   :  { %v714_v0 = vadd.f32 %v713_v57, %v712_v48  ;;  %v910_v5 = vadd.f32 %v909_v51, %v908_v43  ;;  %v913_v36 = vsel %vm82_vm1, %v825_v52, 0.0  ;;  %v2092_v51 = vpop.f32.mrb[22].mxu1 }
 0x10b   :  { %v911_v18 = vsel %vm82_vm1, %v824_v59, 0.0  ;;  %v2081_v20 = vpop.f32.mrb[26].mxu0  ;;  %3489 = vst [vmem:[#allocation21_spill] sm:$0xff] %v2092_v51  ;;  %v2094_v40 = vpop.f32.mrb[23].mxu1 }
 0x10c   :  { %3487 = vst [vmem:[#allocation19_spill] sm:$0xff] %v2081_v20  ;;  %v912_v22 = vadd.f32 %v911_v18, %v910_v5  ;;  %v2083_v24 = vpop.f32.mrb[27].mxu0  ;;  %v716_v28 = vadd.f32 %v715_v14, %v714_v0  ;;  %v827_v38 = vmul.f32 %v2081_v20, %v2081_v20  ;;  %3490 = vst [vmem:[#allocation22_spill] sm:$0xff] %v2094_v40  ;;  %v719_v0 = vsel %vm82_vm1, %v2081_v20, 0.0 }
 0x10d   :  { %3488 = vst [vmem:[#allocation20_spill] sm:$0xff] %v2083_v24  ;;  %v717_v43 = vsel %vm82_vm1, %v2083_v24, 0.0  ;;  %v826_v48 = vmul.f32 %v2083_v24, %v2083_v24 }
 0x10e   :  { %v718_v57 = vadd.f32 %v717_v43, %v716_v28  ;;  %v914_v59 = vadd.f32 %v913_v36, %v912_v22  ;;  %v917_v3 = vsel %vm82_vm1, %v827_v38, 0.0  ;;  %v2110_v36 = vpop.f32.mrb[24].mxu1 }
 0x10f   :  { %v915_v52 = vsel %vm82_vm1, %v826_v48, 0.0  ;;  %v2099_v5 = vpop.f32.mrb[28].mxu0  ;;  %3493 = vst [vmem:[#allocation25_spill] sm:$0xff] %v2110_v36  ;;  %v2112_v20 = vpop.f32.mrb[25].mxu1 }
 0x110   :  { %3491 = vst [vmem:[#allocation23_spill] sm:$0xff] %v2099_v5  ;;  %v916_v14 = vadd.f32 %v915_v52, %v914_v59  ;;  %v2101_v18 = vpop.f32.mrb[29].mxu0  ;;  %v720_v46 = vadd.f32 %v719_v0, %v718_v57  ;;  %v829_v24 = vmul.f32 %v2099_v5, %v2099_v5  ;;  %v723_v57 = vsel %vm82_vm1, %v2099_v5, 0.0 }
 0x111   :  { %3492 = vst [vmem:[#allocation24_spill] sm:$0xff] %v2101_v18  ;;  %v721_v22 = vsel %vm82_vm1, %v2101_v18, 0.0  ;;  %v828_v28 = vmul.f32 %v2101_v18, %v2101_v18  ;;  %v832_v18 = vmul.f32 %v1896_v30, %v1896_v30 }
 0x112   :  { %v722_v43 = vadd.f32 %v721_v22, %v720_v46  ;;  %v918_v48 = vadd.f32 %v917_v3, %v916_v14  ;;  %v921_v39 = vsel %vm82_vm1, %v829_v24, 0.0  ;;  %v2130_v22 = vpop.f32.mrb[26].mxu1 }
 0x113   :  { %v919_v38 = vsel %vm82_vm1, %v828_v28, 0.0  ;;  %v2117_v59 = vpop.f32.mrb[30].mxu0  ;;  %3496 = vst [vmem:[#allocation28_spill] sm:$0xff] %v2130_v22 }
 0x114   :  { %3494 = vst [vmem:[#allocation26_spill] sm:$0xff] %v2117_v59  ;;  %v920_v0 = vadd.f32 %v919_v38, %v918_v48  ;;  %v2119_v52 = vpop.f32.mrb[31].mxu0  ;;  %v724_v8 = vadd.f32 %v723_v57, %v722_v43  ;;  %v831_v3 = vmul.f32 %v2117_v59, %v2117_v59  ;;  %v2132_v38 = vpop.f32.mrb[27].mxu1  ;;  %v727_v43 = vsel %vm82_vm1, %v2117_v59, 0.0 }
 0x115   :  { %3495 = vst [vmem:[#allocation27_spill] sm:$0xff] %v2119_v52  ;;  %v725_v46 = vsel %vm82_vm1, %v2119_v52, 0.0  ;;  %v830_v14 = vmul.f32 %v2119_v52, %v2119_v52  ;;  %3497 = vst [vmem:[#allocation29_spill] sm:$0xff] %v2132_v38  ;;  %v729_v57 = vsel %vm82_vm1, %v1896_v30, 0.0  ;;  %v833_v52 = vmul.f32 %v1894_v27, %v1894_v27 }
 0x116   :  { %v726_v28 = vadd.f32 %v725_v46, %v724_v8  ;;  %v922_v48 = vadd.f32 %v921_v39, %v920_v0  ;;  %v925_v13 = vsel %vm82_vm1, %v831_v3, 0.0  ;;  %v927_v8 = vsel %vm82_vm1, %v832_v18, 0.0  ;;  %v2145_v0 = vpop.f32.mrb[28].mxu1 }
 0x117   :  { %v923_v24 = vsel %vm82_vm1, %v830_v14, 0.0  ;;  %v834_v39 = vmul.f32 %v1914_v44, %v1914_v44  ;;  %3498 = vst [vmem:[#allocation30_spill] sm:$0xff] %v2145_v0  ;;  %v2147_v14 = vpop.f32.mrb[29].mxu1  ;;  %v733_v3 = vsel %vm82_vm1, %v1914_v44, 0.0  ;;  %v835_v18 = vmul.f32 %v1912_v41, %v1912_v41 }
 0x118   :  { %v728_v5 = vadd.f32 %v727_v43, %v726_v28  ;;  %v924_v42 = vadd.f32 %v923_v24, %v922_v48  ;;  %3499 = vst [vmem:[#allocation31_spill] sm:$0xff] %v2147_v14  ;;  %v731_v28 = vsel %vm82_vm1, %v1894_v27, 0.0  ;;  %v929_v24 = vsel %vm82_vm1, %v833_v52, 0.0 }
 0x119   :  { %v931_v30 = vsel %vm82_vm1, %v834_v39, 0.0  ;;  %v837_v39 = vmul.f32 %v1930_v55, %v1930_v55 }
 0x11a   :  { %v926_v46 = vadd.f32 %v925_v13, %v924_v42  ;;  %v730_v59 = vadd.f32 %v729_v57, %v728_v5  ;;  %v836_v13 = vmul.f32 %v1932_v58, %v1932_v58  ;;  %v2159_v42 = vpop.f32.mrb[30].mxu1 }
 0x11b   :  { %v2161_v27 = vpop.f32.mrb[31].mxu1 }
 0x11c   :  { %v928_v48 = vadd.f32 %v927_v8, %v926_v46  ;;  %v732_v43 = vadd.f32 %v731_v28, %v730_v59  ;;  %3500 = vst [vmem:[#allocation32_spill] sm:$0xff] %v2161_v27  ;;  %v735_v8 = vsel %vm82_vm1, %v1912_v41, 0.0  ;;  %v737_v59 = vsel %vm82_vm1, %v1932_v58, 0.0 }
 0x11d   :  { %v933_v28 = vsel %vm82_vm1, %v835_v18, 0.0  ;;  %v935_v44 = vsel %vm82_vm1, %v836_v13, 0.0  ;;  %v741_v58 = vsel %vm82_vm1, %v1950_v11, 0.0  ;;  %v937_v18 = vsel %vm82_vm1, %v837_v39, 0.0 }
 0x11e   :  { %v734_v5 = vadd.f32 %v733_v3, %v732_v43  ;;  %v930_v57 = vadd.f32 %v929_v24, %v928_v48  ;;  %v838_v3 = vmul.f32 %v1950_v11, %v1950_v11  ;;  %v739_v24 = vsel %vm82_vm1, %v1930_v55, 0.0 }
 0x120   :  { %v932_v52 = vadd.f32 %v931_v30, %v930_v57  ;;  %v736_v46 = vadd.f32 %v735_v8, %v734_v5  ;;  %v839_v57 = vmul.f32 %v1948_v7, %v1948_v7  ;;  %v939_v13 = vsel %vm82_vm1, %v838_v3, 0.0 }
 0x121   :  { %v840_v8 = vmul.f32 %v1968_v29, %v1968_v29 }
 0x122   :  { %v738_v48 = vadd.f32 %v737_v59, %v736_v46  ;;  %v934_v43 = vadd.f32 %v933_v28, %v932_v52  ;;  %v743_v46 = vsel %vm82_vm1, %v1948_v7, 0.0  ;;  %v745_v28 = vsel %vm82_vm1, %v1968_v29, 0.0 }
 0x123   :  { %v941_v39 = vsel %vm82_vm1, %v839_v57, 0.0  ;;  %v943_v3 = vsel %vm82_vm1, %v840_v8, 0.0 }
 0x124   :  { %v936_v30 = vadd.f32 %v935_v44, %v934_v43  ;;  %v740_v5 = vadd.f32 %v739_v24, %v738_v48  ;;  %v841_v43 = vmul.f32 %v1966_v25, %v1966_v25  ;;  %v842_v24 = vmul.f32 %v1986_v50, %v1986_v50 }
 0x126   :  { %v742_v59 = vadd.f32 %v741_v58, %v740_v5  ;;  %v938_v52 = vadd.f32 %v937_v18, %v936_v30  ;;  %v747_v5 = vsel %vm82_vm1, %v1966_v25, 0.0  ;;  %v749_v18 = vsel %vm82_vm1, %v1986_v50, 0.0 }
 0x127   :  { %v945_v57 = vsel %vm82_vm1, %v841_v43, 0.0  ;;  %v947_v8 = vsel %vm82_vm1, %v842_v24, 0.0 }
 0x128   :  { %v940_v44 = vadd.f32 %v939_v13, %v938_v52  ;;  %v744_v48 = vadd.f32 %v743_v46, %v742_v59  ;;  %v843_v52 = vmul.f32 %v1984_v45, %v1984_v45  ;;  %v844_v46 = vmul.f32 %v2004_v6, %v2004_v6 }
 0x12a   :  { %v746_v58 = vadd.f32 %v745_v28, %v744_v48  ;;  %v942_v30 = vadd.f32 %v941_v39, %v940_v44  ;;  %v751_v48 = vsel %vm82_vm1, %v1984_v45, 0.0  ;;  %v753_v39 = vsel %vm82_vm1, %v2004_v6, 0.0 }
 0x12b   :  { %v949_v43 = vsel %vm82_vm1, %v843_v52, 0.0  ;;  %v951_v24 = vsel %vm82_vm1, %v844_v46, 0.0 }
 0x12c   :  { %v944_v13 = vadd.f32 %v943_v3, %v942_v30  ;;  %v748_v59 = vadd.f32 %v747_v5, %v746_v58  ;;  %v845_v30 = vmul.f32 %v2002_v2, %v2002_v2  ;;  %v846_v5 = vmul.f32 %v2022_v32, %v2022_v32 }
 0x12e   :  { %v750_v28 = vadd.f32 %v749_v18, %v748_v59  ;;  %v946_v44 = vadd.f32 %v945_v57, %v944_v13  ;;  %v755_v59 = vsel %vm82_vm1, %v2002_v2, 0.0  ;;  %v757_v57 = vsel %vm82_vm1, %v2022_v32, 0.0 }
 0x12f   :  { %v953_v52 = vsel %vm82_vm1, %v845_v30, 0.0  ;;  %v955_v46 = vsel %vm82_vm1, %v846_v5, 0.0 }
 0x130   :  { %v948_v3 = vadd.f32 %v947_v8, %v946_v44  ;;  %v752_v58 = vadd.f32 %v751_v48, %v750_v28  ;;  %v847_v44 = vmul.f32 %v2020_v26, %v2020_v26  ;;  %v848_v48 = vmul.f32 %v2040_v60, %v2040_v60 }
 0x132   :  { %v754_v18 = vadd.f32 %v753_v39, %v752_v58  ;;  %v950_v13 = vadd.f32 %v949_v43, %v948_v3  ;;  %v759_v58 = vsel %vm82_vm1, %v2020_v26, 0.0  ;;  %v761_v43 = vsel %vm82_vm1, %v2040_v60, 0.0 }
 0x133   :  { %v957_v30 = vsel %vm82_vm1, %v847_v44, 0.0  ;;  %v959_v5 = vsel %vm82_vm1, %v848_v48, 0.0 }
 0x134   :  { %v952_v8 = vadd.f32 %v951_v24, %v950_v13  ;;  %v756_v28 = vadd.f32 %v755_v59, %v754_v18  ;;  %v849_v13 = vmul.f32 %v2038_v54, %v2038_v54  ;;  %v850_v59 = vmul.f32 %v2058_v31, %v2058_v31 }
 0x136   :  { %v758_v39 = vadd.f32 %v757_v57, %v756_v28  ;;  %v954_v3 = vadd.f32 %v953_v52, %v952_v8  ;;  %v763_v28 = vsel %vm82_vm1, %v2038_v54, 0.0  ;;  %v765_v52 = vsel %vm82_vm1, %v2058_v31, 0.0 }
 0x137   :  { %v961_v44 = vsel %vm82_vm1, %v849_v13, 0.0  ;;  %v963_v48 = vsel %vm82_vm1, %v850_v59, 0.0 }
 0x138   :  { %v956_v24 = vadd.f32 %v955_v46, %v954_v3  ;;  %v760_v18 = vadd.f32 %v759_v58, %v758_v39  ;;  %v851_v3 = vmul.f32 %v2056_v23, %v2056_v23  ;;  %v852_v58 = vmul.f32 %v2076_v9, %v2076_v9 }
 0x13a   :  { %v762_v57 = vadd.f32 %v761_v43, %v760_v18  ;;  %v958_v8 = vadd.f32 %v957_v30, %v956_v24  ;;  %v767_v18 = vsel %vm82_vm1, %v2056_v23, 0.0  ;;  %v769_v30 = vsel %vm82_vm1, %v2076_v9, 0.0 }
 0x13b   :  { %v965_v13 = vsel %vm82_vm1, %v851_v3, 0.0  ;;  %v967_v59 = vsel %vm82_vm1, %v852_v58, 0.0 }
 0x13c   :  { %v960_v46 = vadd.f32 %v959_v5, %v958_v8  ;;  %v764_v39 = vadd.f32 %v763_v28, %v762_v57  ;;  %v853_v8 = vmul.f32 %v2074_v62, %v2074_v62  ;;  %v854_v28 = vmul.f32 %v2094_v40, %v2094_v40 }
 0x13e   :  { %v766_v43 = vadd.f32 %v765_v52, %v764_v39  ;;  %v962_v24 = vadd.f32 %v961_v44, %v960_v46  ;;  %v771_v39 = vsel %vm82_vm1, %v2074_v62, 0.0  ;;  %v773_v44 = vsel %vm82_vm1, %v2094_v40, 0.0 }
 0x13f   :  { %v969_v3 = vsel %vm82_vm1, %v853_v8, 0.0  ;;  %v971_v58 = vsel %vm82_vm1, %v854_v28, 0.0 }
 0x140   :  { %v964_v5 = vadd.f32 %v963_v48, %v962_v24  ;;  %v768_v57 = vadd.f32 %v767_v18, %v766_v43  ;;  %v855_v24 = vmul.f32 %v2092_v51, %v2092_v51  ;;  %v856_v18 = vmul.f32 %v2112_v20, %v2112_v20 }
 0x142   :  { %v770_v52 = vadd.f32 %v769_v30, %v768_v57  ;;  %v966_v46 = vadd.f32 %v965_v13, %v964_v5  ;;  %v775_v57 = vsel %vm82_vm1, %v2092_v51, 0.0  ;;  %v777_v13 = vsel %vm82_vm1, %v2112_v20, 0.0 }
 0x143   :  { %v973_v8 = vsel %vm82_vm1, %v855_v24, 0.0  ;;  %v975_v28 = vsel %vm82_vm1, %v856_v18, 0.0 }
 0x144   :  { %v968_v48 = vadd.f32 %v967_v59, %v966_v46  ;;  %v772_v43 = vadd.f32 %v771_v39, %v770_v52  ;;  %v857_v46 = vmul.f32 %v2110_v36, %v2110_v36  ;;  %v858_v39 = vmul.f32 %v2132_v38, %v2132_v38 }
 0x146   :  { %v774_v30 = vadd.f32 %v773_v44, %v772_v43  ;;  %v970_v5 = vadd.f32 %v969_v3, %v968_v48  ;;  %v779_v43 = vsel %vm82_vm1, %v2110_v36, 0.0  ;;  %v781_v3 = vsel %vm82_vm1, %v2132_v38, 0.0 }
 0x147   :  { %v977_v24 = vsel %vm82_vm1, %v857_v46, 0.0  ;;  %v979_v18 = vsel %vm82_vm1, %v858_v39, 0.0 }
 0x148   :  { %v972_v59 = vadd.f32 %v971_v58, %v970_v5  ;;  %v776_v52 = vadd.f32 %v775_v57, %v774_v30  ;;  %v859_v5 = vmul.f32 %v2130_v22, %v2130_v22  ;;  %v860_v57 = vmul.f32 %v2147_v14, %v2147_v14 }
 0x14a   :  { %v778_v44 = vadd.f32 %v777_v13, %v776_v52  ;;  %v974_v48 = vadd.f32 %v973_v8, %v972_v59  ;;  %v783_v52 = vsel %vm82_vm1, %v2130_v22, 0.0  ;;  %v785_v8 = vsel %vm82_vm1, %v2147_v14, 0.0 }
 0x14b   :  { %v981_v46 = vsel %vm82_vm1, %v859_v5, 0.0  ;;  %v983_v39 = vsel %vm82_vm1, %v860_v57, 0.0 }
 0x14c   :  { %v976_v58 = vadd.f32 %v975_v28, %v974_v48  ;;  %v780_v30 = vadd.f32 %v779_v43, %v778_v44  ;;  %v861_v48 = vmul.f32 %v2145_v0, %v2145_v0  ;;  %v862_v43 = vmul.f32 %v2161_v27, %v2161_v27 }
 0x14e   :  { %v782_v13 = vadd.f32 %v781_v3, %v780_v30  ;;  %v978_v59 = vadd.f32 %v977_v24, %v976_v58  ;;  %v787_v30 = vsel %vm82_vm1, %v2145_v0, 0.0  ;;  %v789_v24 = vsel %vm82_vm1, %v2161_v27, 0.0 }
 0x14f   :  { %v985_v5 = vsel %vm82_vm1, %v861_v48, 0.0  ;;  %v987_v57 = vsel %vm82_vm1, %v862_v43, 0.0 }
 0x150   :  { %v980_v28 = vadd.f32 %v979_v18, %v978_v59  ;;  %v784_v44 = vadd.f32 %v783_v52, %v782_v13  ;;  %v863_v59 = vmul.f32 %v2159_v42, %v2159_v42 }
 0x152   :  { %v786_v3 = vadd.f32 %v785_v8, %v784_v44  ;;  %v982_v58 = vadd.f32 %v981_v46, %v980_v28  ;;  %v791_v8 = vsel %vm82_vm1, %v2159_v42, 0.0  ;;  %v989_v46 = vsel %vm82_vm1, %v863_v59, 0.0 }
 0x154   :  { %v984_v18 = vadd.f32 %v983_v39, %v982_v58  ;;  %v788_v13 = vadd.f32 %v787_v30, %v786_v3  ;;  %v1068_v30 = vlaneseq }
 0x156   :  { %v790_v52 = vadd.f32 %v789_v24, %v788_v13  ;;  %v986_v14 = vadd.f32 %v985_v5, %v984_v18  ;;  %v2304_v24 = vshrl.u32 %v1068_v30, 7  ;;  %v3515_v30 = vld [vmem:[#allocation2_spill] sm:$0xff] }
 0x158   :  { %v792_v28 = vadd.f32 %v791_v8, %v790_v52  ;;  %v988_v44 = vadd.f32 %v987_v57, %v986_v14  ;;  %v3514_v8 = vld [vmem:[#allocation3_spill] sm:$0xff]  ;;  %v664_v52 = vld [vmem:[%s3413_s2] sm:$0x1]  ;;  %v3524_v31 = vsub.s32 0, %v2304_v24 }
 0x15a   :  { %v793_v0 = vrot.slane %v792_v28, 4  ;;  %v990_v27 = vadd.f32 %v989_v46, %v988_v44  ;;  %v3512_v46 = vld [vmem:[#allocation27_spill] sm:$0xff]  ;;  %v3513_v44 = vld [vmem:[#allocation26_spill] sm:$0xff] }
 0x15c   :  { %v794_v39 = vadd.f32 %v793_v0, %v792_v28  ;;  %v991_v3 = vrot.slane %v990_v27, 4 }
 0x15e   :  { %v795_v58 = vrot.slane %v794_v39, 2  ;;  %v992_v48 = vadd.f32 %v991_v3, %v990_v27  ;;  %v3510_v3 = vld [vmem:[#allocation24_spill] sm:$0xff]  ;;  %v3519_v27 = vld [vmem:[#allocation29_spill] sm:$0xff] }
 0x160   :  { %v796_v22 = vadd.f32 %v795_v58, %v794_v39  ;;  %v993_v38 = vrot.slane %v992_v48, 2  ;;  %v3522_v58 = vld [vmem:[#allocation30_spill] sm:$0xff] }
 0x162   :  { %v797_v36 = vrot.slane %v796_v22, 1  ;;  %v994_v43 = vadd.f32 %v993_v38, %v992_v48  ;;  %v3507_v48 = vld [vmem:[#allocation15_spill] sm:$0xff]  ;;  %v3517_v38 = vld [vmem:[#allocation5_spill] sm:$0xff] }
 0x164   :  { %v798_v18 = vadd.f32 %v797_v36, %v796_v22  ;;  %v995_v13 = vrot.slane %v994_v43, 1  ;;  %v3516_v22 = vld [vmem:[#allocation4_spill] sm:$0xff] }
 0x165   :  { %v3523_v36 = vld [vmem:[#allocation32_spill] sm:$0xff] }
 0x166   :  { %v2306_v5 = vmul.f32 0.001953125, %v798_v18  ;;  %v996_v14 = vadd.f32 %v995_v13, %v994_v43  ;;  %v3502_v18 = vld [vmem:[#allocation8_spill] sm:$0xff]  ;;  %v3503_v13 = vld [vmem:[#allocation7_spill] sm:$0xff] }
 0x168   :  { %v997_v57 = vmul.f32 0.001953125, %v996_v14  ;;  %v998_v0 = vmul.f32 %v2306_v5, %v2306_v5  ;;  %v3504_v14 = vld [vmem:[#allocation12_spill] sm:$0xff]  ;;  %v3525_v9 = vsub.f32 %v1862_v4, %v2306_v5  ;;  %v3526_v40 = vsub.f32 %v1856_v1, %v2306_v5 }
 0x169   :  { %v3531_v24 = vsub.f32 %v1903_v35, %v2306_v5 }
 0x16a   :  { %v999_v28 = vsub.f32 %v997_v57, %v998_v0  ;;  %v3505_v57 = vld [vmem:[#allocation11_spill] sm:$0xff]  ;;  %v3506_v0 = vld [vmem:[#allocation16_spill] sm:$0xff] }
 0x16c   :  { %v1000_v43 = vadd.f32 1e-05, %v999_v28  ;;  %v3501_v28 = vld [vmem:[#allocation6_spill] sm:$0xff] }
 0x16e   :  { %1570 = vrsqrt.f32 %v1000_v43  ;;  %v3521_v43 = vld [vmem:[#allocation31_spill] sm:$0xff] }
 0x178   :  { %v1571_v60 = vpop.eup %1570 }
 0x179   :  { %v1002_v39 = vmul.f32 %v1571_v60, %v664_v52  ;;  %v3527_v60 = vsub.f32 %v1872_v12, %v2306_v5 }
 0x17b   :  { %v2444_v23 = vrot.slane %v1002_v39, %v3524_v31  ;;  %v3528_v31 = vsub.f32 %v1870_v10, %v2306_v5  ;;  %v3532_v39 = vsub.f32 %v1901_v33, %v2306_v5 }
 0x17d   :  { %v2450_v59 = vmul.f32 %v2444_v23, %v3525_v9  ;;  %v2456_v62 = vmul.f32 %v2444_v23, %v3526_v40  ;;  %v2462_v52 = vmul.f32 %v2444_v23, %v3527_v60  ;;  %v2468_v4 = vmul.f32 %v2444_v23, %v3528_v31 }
 0x17e   :  { %v3529_v9 = vsub.f32 %v1885_v21, %v2306_v5  ;;  %v3530_v40 = vsub.f32 %v1883_v19, %v2306_v5  ;;  %v2486_v10 = vmul.f32 %v2444_v23, %v3531_v24  ;;  %v2492_v21 = vmul.f32 %v2444_v23, %v3532_v39 }
 0x17f   :  { %v3533_v60 = vsub.f32 %v1921_v49, %v2306_v5  ;;  %v3534_v31 = vsub.f32 %v1919_v47, %v2306_v5  ;;  %v3537_v24 = vsub.f32 %v1957_v17, %v2306_v5  ;;  %v3538_v39 = vsub.f32 %v1955_v15, %v2306_v5 }
 0x180   :  { %v2474_v1 = vmul.f32 %v2444_v23, %v3529_v9  ;;  %v2480_v12 = vmul.f32 %v2444_v23, %v3530_v40  ;;  %v3535_v9 = vsub.f32 %v1939_v63, %v2306_v5  ;;  %v3536_v40 = vsub.f32 %v1937_v61, %v2306_v5 }
 0x181   :  { %v2498_v19 = vmul.f32 %v2444_v23, %v3533_v60  ;;  %v2504_v35 = vmul.f32 %v2444_v23, %v3534_v31  ;;  %v2522_v47 = vmul.f32 %v2444_v23, %v3537_v24  ;;  %v2528_v63 = vmul.f32 %v2444_v23, %v3538_v39 }
 0x182   :  { %v2510_v33 = vmul.f32 %v2444_v23, %v3535_v9  ;;  %v2516_v49 = vmul.f32 %v2444_v23, %v3536_v40  ;;  %v3539_v60 = vsub.f32 %v1975_v37, %v2306_v5  ;;  %v3540_v31 = vsub.f32 %v1973_v34, %v2306_v5 }
 0x183   :  { %v3541_v9 = vsub.f32 %v1993_v56, %v2306_v5  ;;  %v3542_v40 = vsub.f32 %v1991_v53, %v2306_v5  ;;  %v3543_v24 = vsub.f32 %v2011_v16, %v2306_v5  ;;  %v3544_v39 = vsub.f32 %v3501_v28, %v2306_v5 }
 0x184   :  { %v2534_v61 = vmul.f32 %v2444_v23, %v3539_v60  ;;  %v2540_v17 = vmul.f32 %v2444_v23, %v3540_v31  ;;  %v3545_v60 = vsub.f32 %v3502_v18, %v2306_v5  ;;  %v3546_v31 = vsub.f32 %v3503_v13, %v2306_v5 }
 0x185   :  { %v2546_v15 = vmul.f32 %v2444_v23, %v3541_v9  ;;  %v2552_v37 = vmul.f32 %v2444_v23, %v3542_v40  ;;  %v2558_v34 = vmul.f32 %v2444_v23, %v3543_v24  ;;  %v2564_v56 = vmul.f32 %v2444_v23, %v3544_v39 }
 0x186   :  { %v2570_v53 = vmul.f32 %v2444_v23, %v3545_v60  ;;  %v2576_v16 = vmul.f32 %v2444_v23, %v3546_v31  ;;  %v3547_v9 = vsub.f32 %v3504_v14, %v2306_v5  ;;  %v3548_v40 = vsub.f32 %v3505_v57, %v2306_v5  ;;  %v3551_v60 = vld [vmem:[#allocation20_spill] sm:$0xff] }
 0x187   :  { %v3549_v24 = vsub.f32 %v3506_v0, %v2306_v5  ;;  %v3550_v39 = vsub.f32 %v3507_v48, %v2306_v5  ;;  %v3552_v31 = vsub.f32 %v3551_v60, %v2306_v5 }
 0x188   :  { %v2582_v28 = vmul.f32 %v2444_v23, %v3547_v9  ;;  %v2588_v18 = vmul.f32 %v2444_v23, %v3548_v40  ;;  %v3553_v9 = vld [vmem:[#allocation19_spill] sm:$0xff] }
 0x189   :  { %v2594_v13 = vmul.f32 %v2444_v23, %v3549_v24  ;;  %v2600_v14 = vmul.f32 %v2444_v23, %v3550_v39  ;;  %v2606_v57 = vmul.f32 %v2444_v23, %v3552_v31  ;;  %v3554_v40 = vsub.f32 %v3553_v9, %v2306_v5  ;;  %v3556_v39 = vld [vmem:[#allocation23_spill] sm:$0xff] }
 0x18a   :  { %v3555_v24 = vsub.f32 %v3510_v3, %v2306_v5  ;;  %v3557_v54 = vsub.f32 %v3556_v39, %v2306_v5  ;;  %v3558_v31 = vsub.f32 %v3512_v46, %v2306_v5 }
 0x18b   :  { %v2612_v0 = vmul.f32 %v2444_v23, %v3554_v40  ;;  %v3559_v40 = vsub.f32 %v3513_v44, %v2306_v5 }
 0x18c   :  { %v2618_v48 = vmul.f32 %v2444_v23, %v3555_v24  ;;  %v2624_v60 = vmul.f32 %v2444_v23, %v3557_v54  ;;  %v2630_v9 = vmul.f32 %v2444_v23, %v3558_v31  ;;  %v3560_v24 = vsub.f32 %v3514_v8, %v2306_v5 }
 0x18d   :  { %v2636_v3 = vmul.f32 %v2444_v23, %v3559_v40  ;;  %v3561_v54 = vsub.f32 %v3515_v30, %v2306_v5  ;;  %v3562_v31 = vsub.f32 %v3516_v22, %v2306_v5  ;;  %v3563_v40 = vsub.f32 %v1912_v41, %v2306_v5 }
 0x18e   :  { %v2642_v39 = vmul.f32 %v2444_v23, %v3560_v24  ;;  %v3564_v24 = vsub.f32 %v3517_v38, %v2306_v5 }
 0x18f   :  { %v2648_v46 = vmul.f32 %v2444_v23, %v3561_v54  ;;  %v2654_v44 = vmul.f32 %v2444_v23, %v3562_v31  ;;  %v2660_v8 = vmul.f32 %v2444_v23, %v3563_v40  ;;  %v3565_v54 = vsub.f32 %v1930_v55, %v2306_v5 }
 0x190   :  { %v2666_v30 = vmul.f32 %v2444_v23, %v3564_v24  ;;  %v3566_v31 = vsub.f32 %v1950_v11, %v2306_v5  ;;  %v3567_v40 = vsub.f32 %v1948_v7, %v2306_v5  ;;  %v3568_v24 = vsub.f32 %v1968_v29, %v2306_v5 }
 0x191   :  { %v2672_v22 = vmul.f32 %v2444_v23, %v3565_v54  ;;  %v3569_v54 = vsub.f32 %v1966_v25, %v2306_v5 }
 0x192   :  { %v2678_v41 = vmul.f32 %v2444_v23, %v3566_v31  ;;  %v2684_v38 = vmul.f32 %v2444_v23, %v3567_v40  ;;  %v2690_v55 = vmul.f32 %v2444_v23, %v3568_v24  ;;  %v3570_v31 = vsub.f32 %v1986_v50, %v2306_v5 }
 0x193   :  { %v2696_v11 = vmul.f32 %v2444_v23, %v3569_v54  ;;  %v3571_v40 = vsub.f32 %v1984_v45, %v2306_v5  ;;  %v3572_v24 = vsub.f32 %v2004_v6, %v2306_v5  ;;  %v3574_v54 = vsub.f32 %v2002_v2, %v2306_v5 }
 0x194   :  { %v2702_v7 = vmul.f32 %v2444_v23, %v3570_v31  ;;  %v3576_v31 = vsub.f32 %v2022_v32, %v2306_v5 }
 0x195   :  { %v2708_v29 = vmul.f32 %v2444_v23, %v3571_v40  ;;  %v2714_v25 = vmul.f32 %v2444_v23, %v3572_v24  ;;  %v2720_v50 = vmul.f32 %v2444_v23, %v3574_v54  ;;  %v3578_v40 = vsub.f32 %v2020_v26, %v2306_v5  ;;  %v3580_v24 = vld [vmem:[#allocation10_spill] sm:$0xff]  ;;  %v3583_v54 = vld [vmem:[#allocation9_spill] sm:$0xff] }
 0x196   :  { %v2726_v45 = vmul.f32 %v2444_v23, %v3576_v31  ;;  %v3581_v51 = vsub.f32 %v3580_v24, %v2306_v5  ;;  %v3586_v31 = vld [vmem:[#allocation14_spill] sm:$0xff] }
 0x197   :  { %3573 = vst [vmem:[#allocation6_spill] sm:$0xff] %v2714_v25  ;;  %3575 = vst [vmem:[#allocation8_spill] sm:$0xff] %v2720_v50  ;;  %v2732_v6 = vmul.f32 %v2444_v23, %v3578_v40  ;;  %v3584_v50 = vsub.f32 %v3583_v54, %v2306_v5  ;;  %v3589_v40 = vld [vmem:[#allocation13_spill] sm:$0xff]  ;;  %v3592_v54 = vld [vmem:[#allocation18_spill] sm:$0xff] }
 0x198   :  { %3577 = vst [vmem:[#allocation7_spill] sm:$0xff] %v2726_v45  ;;  %v2738_v2 = vmul.f32 %v2444_v23, %v3581_v51  ;;  %v3587_v45 = vsub.f32 %v3586_v31, %v2306_v5  ;;  %v2761_v51 = vld [vmem:[%s3414_s3] ss:$0 sm:$0xff]  ;;  %v3594_v31 = vld [vmem:[#allocation17_spill] sm:$0xff] }
 0x199   :  { %3579 = vst [vmem:[#allocation12_spill] sm:$0xff] %v2732_v6  ;;  %v2744_v32 = vmul.f32 %v2444_v23, %v3584_v50  ;;  %v3590_v6 = vsub.f32 %v3589_v40, %v2306_v5  ;;  %v3593_v50 = vsub.f32 %v3592_v54, %v2306_v5  ;;  %v3597_v40 = vld [vmem:[#allocation22_spill] sm:$0xff] }
 0x19a   :  { %3582 = vst [vmem:[#allocation11_spill] sm:$0xff] %v2738_v2  ;;  %v2750_v26 = vmul.f32 %v2444_v23, %v3587_v45  ;;  %v3595_v45 = vsub.f32 %v3594_v31, %v2306_v5  ;;  %v3599_v2 = vld [vmem:[#allocation21_spill] sm:$0xff] }
 0x19b   :  { %3585 = vst [vmem:[#allocation16_spill] sm:$0xff] %v2744_v32  ;;  %v2756_v24 = vmul.f32 %v2444_v23, %v3590_v6  ;;  %v2767_v32 = vmul.f32 %v2444_v23, %v3593_v50  ;;  %v3598_v6 = vsub.f32 %v3597_v40, %v2306_v5  ;;  %v3600_v25 = vsub.f32 %v3599_v2, %v2306_v5 }
 0x19c   :  { %3588 = vst [vmem:[#allocation15_spill] sm:$0xff] %v2750_v26  ;;  %v2773_v26 = vmul.f32 %v2444_v23, %v3595_v45  ;;  %v3602_v50 = vsub.f32 %v2112_v20, %v2306_v5  ;;  %v3603_v45 = vld [vmem:[#allocation25_spill] sm:$0xff] }
 0x19d   :  { %3591 = vst [vmem:[#allocation24_spill] sm:$0xff] %v2756_v24  ;;  %v2779_v24 = vmul.f32 %v2444_v23, %v3598_v6  ;;  %v2785_v54 = vmul.f32 %v2444_v23, %v3600_v25  ;;  %v3605_v6 = vsub.f32 %v3519_v27, %v2306_v5  ;;  %v3606_v25 = vld [vmem:[#allocation28_spill] sm:$0xff] }
 0x19e   :  { %3596 = vst [vmem:[#allocation27_spill] sm:$0xff] %v2773_v26  ;;  %v2791_v31 = vmul.f32 %v2444_v23, %v3602_v50  ;;  %v3604_v26 = vsub.f32 %v3603_v45, %v2306_v5  ;;  %v3608_v50 = vsub.f32 %v3521_v43, %v2306_v5 }
 0x19f   :  { %3601 = vst [vmem:[#allocation26_spill] sm:$0xff] %v2785_v54  ;;  %v2803_v2 = vmul.f32 %v2444_v23, %v3605_v6  ;;  %v3607_v54 = vsub.f32 %v3606_v25, %v2306_v5  ;;  %v3610_v6 = vsub.f32 %v3523_v36, %v2306_v5  ;;  %v2845_v36 = vadd.f32 %v2761_v51, %v2462_v52 }
 0x1a0   :  { %v2797_v40 = vmul.f32 %v2444_v23, %v3604_v26  ;;  %v2815_v45 = vmul.f32 %v2444_v23, %v3608_v50  ;;  %v3609_v26 = vsub.f32 %v3522_v58, %v2306_v5  ;;  %v2837_v50 = vadd.f32 %v2761_v51, %v2450_v59 }
 0x1a1   :  { %v2809_v20 = vmul.f32 %v2444_v23, %v3607_v54  ;;  %v2827_v25 = vmul.f32 %v2444_v23, %v3610_v6  ;;  %v3611_v54 = vsub.f32 %v2159_v42, %v2306_v5  ;;  %v2841_v58 = vadd.f32 %v2761_v51, %v2456_v62  ;;  %v3618_v6 = vld [vmem:[#allocation7_spill] sm:$0xff] }
 0x1a2   :  { %v2821_v27 = vmul.f32 %v2444_v23, %v3609_v26  ;;  %v2849_v26 = vadd.f32 %v2761_v51, %v2468_v4  ;;  %v2857_v42 = vadd.f32 %v2761_v51, %v2480_v12  ;;  %v2861_v62 = vadd.f32 %v2761_v51, %v2486_v10 }
 0x1a3   :  { %v2833_v43 = vmul.f32 %v2444_v23, %v3611_v54  ;;  %v2853_v23 = vadd.f32 %v2761_v51, %v2474_v1  ;;  %v2865_v5 = vadd.f32 %v2761_v51, %v2492_v21  ;;  %v2869_v59 = vadd.f32 %v2761_v51, %v2498_v19  ;;  %v3619_v54 = vld [vmem:[#allocation12_spill] sm:$0xff] }
 0x1a4   :  { %v2873_v52 = vadd.f32 %v2761_v51, %v2504_v35  ;;  %v2877_v4 = vadd.f32 %v2761_v51, %v2510_v33  ;;  %v2881_v1 = vadd.f32 %v2761_v51, %v2516_v49  ;;  %v2885_v12 = vadd.f32 %v2761_v51, %v2522_v47 }
 0x1a5   :  { %v2889_v10 = vadd.f32 %v2761_v51, %v2528_v63  ;;  %v2893_v21 = vadd.f32 %v2761_v51, %v2534_v61  ;;  %v2897_v19 = vadd.f32 %v2761_v51, %v2540_v17  ;;  %v2901_v35 = vadd.f32 %v2761_v51, %v2546_v15 }
 0x1a6   :  { %v2905_v33 = vadd.f32 %v2761_v51, %v2552_v37  ;;  %v2909_v49 = vadd.f32 %v2761_v51, %v2558_v34  ;;  %v2913_v47 = vadd.f32 %v2761_v51, %v2564_v56  ;;  %v2917_v63 = vadd.f32 %v2761_v51, %v2570_v53 }
 0x1a7   :  { %v2921_v61 = vadd.f32 %v2761_v51, %v2576_v16  ;;  %v2925_v17 = vadd.f32 %v2761_v51, %v2582_v28  ;;  %v2929_v15 = vadd.f32 %v2761_v51, %v2588_v18  ;;  %v2933_v37 = vadd.f32 %v2761_v51, %v2594_v13 }
 0x1a8   :  { %v2937_v34 = vadd.f32 %v2761_v51, %v2600_v14  ;;  %v2941_v56 = vadd.f32 %v2761_v51, %v2606_v57  ;;  %v2945_v53 = vadd.f32 %v2761_v51, %v2612_v0  ;;  %v2949_v16 = vadd.f32 %v2761_v51, %v2618_v48 }
 0x1a9   :  { %v2953_v28 = vadd.f32 %v2761_v51, %v2624_v60  ;;  %v2957_v18 = vadd.f32 %v2761_v51, %v2630_v9  ;;  %v2961_v13 = vadd.f32 %v2761_v51, %v2636_v3  ;;  %v2965_v14 = vadd.f32 %v2761_v51, %v2642_v39 }
 0x1aa   :  { %v2969_v57 = vadd.f32 %v2761_v51, %v2648_v46  ;;  %v2973_v0 = vadd.f32 %v2761_v51, %v2654_v44  ;;  %v2977_v48 = vadd.f32 %v2761_v51, %v2660_v8  ;;  %v2981_v60 = vadd.f32 %v2761_v51, %v2666_v30 }
 0x1ab   :  { %v2985_v9 = vadd.f32 %v2761_v51, %v2672_v22  ;;  %v2989_v3 = vadd.f32 %v2761_v51, %v2678_v41  ;;  %v2993_v39 = vadd.f32 %v2761_v51, %v2684_v38  ;;  %v2997_v46 = vadd.f32 %v2761_v51, %v2690_v55  ;;  %v3614_v22 = vld [vmem:[#allocation6_spill] sm:$0xff]  ;;  %v3616_v38 = vld [vmem:[#allocation8_spill] sm:$0xff] }
 0x1ac   :  { %v3001_v44 = vadd.f32 %v2761_v51, %v2696_v11  ;;  %v3005_v8 = vadd.f32 %v2761_v51, %v2702_v7  ;;  %v3009_v30 = vadd.f32 %v2761_v51, %v2708_v29  ;;  %v3013_v41 = vadd.f32 %v2761_v51, %v3614_v22 }
 0x1ad   :  { %v3017_v55 = vadd.f32 %v2761_v51, %v3616_v38  ;;  %v3021_v11 = vadd.f32 %v2761_v51, %v3618_v6  ;;  %v3025_v7 = vadd.f32 %v2761_v51, %v3619_v54  ;;  %v3045_v54 = vadd.f32 %v2761_v51, %v2767_v32 }
 0x1ae   :  { %3612 = vst [vmem:[#allocation3_spill] sm:$0xff] %v3005_v8  ;;  %3613 = vst [vmem:[#allocation2_spill] sm:$0xff] %v3009_v30  ;;  %v3621_v8 = vld [vmem:[#allocation11_spill] sm:$0xff]  ;;  %v3622_v30 = vld [vmem:[#allocation16_spill] sm:$0xff]  ;;  %v3065_v32 = vadd.f32 %v2761_v51, %v2797_v40  ;;  %v3085_v40 = vadd.f32 %v2761_v51, %v2827_v25  ;;  %v1214_v25 = vmax.f32 %v2865_v5, 0.0  ;;  %v1225_v5 = vmax.f32 %v2909_v49, 0.0 }
 0x1af   :  { %3615 = vst [vmem:[#allocation4_spill] sm:$0xff] %v3013_v41  ;;  %3617 = vst [vmem:[#allocation5_spill] sm:$0xff] %v3017_v55  ;;  %v3029_v29 = vadd.f32 %v2761_v51, %v3621_v8  ;;  %v3033_v22 = vadd.f32 %v2761_v51, %v3622_v30  ;;  %v3624_v41 = vld [vmem:[#allocation15_spill] sm:$0xff]  ;;  %v3625_v55 = vld [vmem:[#allocation24_spill] sm:$0xff]  ;;  %v3053_v30 = vadd.f32 %v2761_v51, %v2779_v24  ;;  %v1236_v49 = vmax.f32 %v2953_v28, 0.0 }
 0x1b0   :  { %3620 = vst [vmem:[#allocation29_spill] sm:$0xff] %v3025_v7  ;;  %v3037_v38 = vadd.f32 %v2761_v51, %v3624_v41  ;;  %v3041_v6 = vadd.f32 %v2761_v51, %v3625_v55  ;;  %v3626_v7 = vld [vmem:[#allocation27_spill] sm:$0xff]  ;;  %v3061_v55 = vadd.f32 %v2761_v51, %v2791_v31  ;;  %v3073_v24 = vadd.f32 %v2761_v51, %v2809_v20 }
 0x1b1   :  { %3623 = vst [vmem:[#allocation31_spill] sm:$0xff] %v3033_v22  ;;  %v3049_v8 = vadd.f32 %v2761_v51, %v3626_v7  ;;  %v3627_v22 = vld [vmem:[#allocation26_spill] sm:$0xff]  ;;  %v3069_v7 = vadd.f32 %v2761_v51, %v2803_v2  ;;  %v3081_v31 = vadd.f32 %v2761_v51, %v2821_v27  ;;  %3632 = vst [vmem:[#allocation23_spill] sm:$0xff] %v3085_v40  ;;  %v1208_v20 = vmax.f32 %v2841_v58, 0.0 }
 0x1b2   :  { %v3057_v41 = vadd.f32 %v2761_v51, %v3627_v22  ;;  %3629 = vst [vmem:[#allocation32_spill] sm:$0xff] %v3073_v24  ;;  %v3077_v22 = vadd.f32 %v2761_v51, %v2815_v45  ;;  %v3089_v2 = vadd.f32 %v2761_v51, %v2833_v43  ;;  %v1209_v24 = vmax.f32 %v2845_v36, 0.0  ;;  %1278 = vst.msk [vmem:[%s3415_s4 + $0x38] sm:$0xff] %vm82_vm1, %v1214_v25 }
 0x1b3   :  { %3628 = vst [vmem:[#allocation30_spill] sm:$0xff] %v3069_v7  ;;  %3631 = vst [vmem:[#allocation19_spill] sm:$0xff] %v3081_v31  ;;  %v1207_v7 = vmax.f32 %v2837_v50, 0.0  ;;  %v1210_v45 = vmax.f32 %v2849_v26, 0.0  ;;  %v1212_v27 = vmax.f32 %v2857_v42, 0.0  ;;  %v1213_v31 = vmax.f32 %v2861_v62, 0.0 }
 0x1b4   :  { %3630 = vst [vmem:[#allocation20_spill] sm:$0xff] %v3077_v22  ;;  %v1211_v22 = vmax.f32 %v2853_v23, 0.0  ;;  %v1215_v40 = vmax.f32 %v2869_v59, 0.0  ;;  %v1216_v51 = vmax.f32 %v2873_v52, 0.0  ;;  %v1217_v43 = vmax.f32 %v2877_v4, 0.0  ;;  %1272 = vst.msk [vmem:[%s3415_s4 + $0x8] sm:$0xff] %vm82_vm1, %v1208_v20 }
 0x1b5   :  { %v1218_v50 = vmax.f32 %v2881_v1, 0.0  ;;  %1271 = vst.msk [vmem:[%s3415_s4] sm:$0xff] %vm82_vm1, %v1207_v7  ;;  %1273 = vst.msk [vmem:[%s3415_s4 + $0x10] sm:$0xff] %vm82_vm1, %v1209_v24  ;;  %v1219_v58 = vmax.f32 %v2885_v12, 0.0  ;;  %v1220_v36 = vmax.f32 %v2889_v10, 0.0  ;;  %v1221_v26 = vmax.f32 %v2893_v21, 0.0 }
 0x1b6   :  { %1274 = vst.msk [vmem:[%s3415_s4 + $0x18] sm:$0xff] %vm82_vm1, %v1210_v45  ;;  %v1222_v23 = vmax.f32 %v2897_v19, 0.0  ;;  %1275 = vst.msk [vmem:[%s3415_s4 + $0x20] sm:$0xff] %vm82_vm1, %v1211_v22  ;;  %v1223_v42 = vmax.f32 %v2901_v35, 0.0  ;;  %v1224_v62 = vmax.f32 %v2905_v33, 0.0  ;;  %v1226_v59 = vmax.f32 %v2913_v47, 0.0 }
 0x1b7   :  { %1276 = vst.msk [vmem:[%s3415_s4 + $0x28] sm:$0xff] %vm82_vm1, %v1212_v27  ;;  %1277 = vst.msk [vmem:[%s3415_s4 + $0x30] sm:$0xff] %vm82_vm1, %v1213_v31  ;;  %v1227_v52 = vmax.f32 %v2917_v63, 0.0  ;;  %v1228_v4 = vmax.f32 %v2921_v61, 0.0  ;;  %v1229_v1 = vmax.f32 %v2925_v17, 0.0  ;;  %v1230_v12 = vmax.f32 %v2929_v15, 0.0 }
 0x1b8   :  { %1279 = vst.msk [vmem:[%s3415_s4 + $0x40] sm:$0xff] %vm82_vm1, %v1215_v40  ;;  %1280 = vst.msk [vmem:[%s3415_s4 + $0x48] sm:$0xff] %vm82_vm1, %v1216_v51  ;;  %v1231_v10 = vmax.f32 %v2933_v37, 0.0  ;;  %v1232_v21 = vmax.f32 %v2937_v34, 0.0  ;;  %v1233_v19 = vmax.f32 %v2941_v56, 0.0  ;;  %v1234_v35 = vmax.f32 %v2945_v53, 0.0 }
 0x1b9   :  { %1281 = vst.msk [vmem:[%s3415_s4 + $0x50] sm:$0xff] %vm82_vm1, %v1217_v43  ;;  %1282 = vst.msk [vmem:[%s3415_s4 + $0x58] sm:$0xff] %vm82_vm1, %v1218_v50  ;;  %v1235_v33 = vmax.f32 %v2949_v16, 0.0  ;;  %v1237_v47 = vmax.f32 %v2957_v18, 0.0  ;;  %v1238_v63 = vmax.f32 %v2961_v13, 0.0  ;;  %v1239_v61 = vmax.f32 %v2965_v14, 0.0 }
 0x1ba   :  { %1283 = vst.msk [vmem:[%s3415_s4 + $0x60] sm:$0xff] %vm82_vm1, %v1219_v58  ;;  %1284 = vst.msk [vmem:[%s3415_s4 + $0x68] sm:$0xff] %vm82_vm1, %v1220_v36  ;;  %v1240_v17 = vmax.f32 %v2969_v57, 0.0  ;;  %v1241_v15 = vmax.f32 %v2973_v0, 0.0  ;;  %v1242_v37 = vmax.f32 %v2977_v48, 0.0  ;;  %v1243_v34 = vmax.f32 %v2981_v60, 0.0 }
 0x1bb   :  { %1285 = vst.msk [vmem:[%s3415_s4 + $0x70] sm:$0xff] %vm82_vm1, %v1221_v26  ;;  %1286 = vst.msk [vmem:[%s3415_s4 + $0x78] sm:$0xff] %vm82_vm1, %v1222_v23  ;;  %v1244_v56 = vmax.f32 %v2985_v9, 0.0  ;;  %v1245_v53 = vmax.f32 %v2989_v3, 0.0  ;;  %v1246_v16 = vmax.f32 %v2993_v39, 0.0  ;;  %v1247_v28 = vmax.f32 %v2997_v46, 0.0 }
 0x1bc   :  { %1287 = vst.msk [vmem:[%s3415_s4 + $0x80] sm:$0xff] %vm82_vm1, %v1223_v42  ;;  %1288 = vst.msk [vmem:[%s3415_s4 + $0x88] sm:$0xff] %vm82_vm1, %v1224_v62  ;;  %v1248_v18 = vmax.f32 %v3001_v44, 0.0  ;;  %v3633_v13 = vld [vmem:[#allocation3_spill] sm:$0xff]  ;;  %v3634_v57 = vld [vmem:[#allocation2_spill] sm:$0xff]  ;;  %v1253_v39 = vmax.f32 %v3021_v11, 0.0 }
 0x1bd   :  { %1289 = vst.msk [vmem:[%s3415_s4 + $0x90] sm:$0xff] %vm82_vm1, %v1225_v5  ;;  %1290 = vst.msk [vmem:[%s3415_s4 + $0x98] sm:$0xff] %vm82_vm1, %v1226_v59  ;;  %v1249_v14 = vmax.f32 %v3633_v13, 0.0  ;;  %v1250_v0 = vmax.f32 %v3634_v57, 0.0  ;;  %v3635_v48 = vld [vmem:[#allocation4_spill] sm:$0xff]  ;;  %v3636_v9 = vld [vmem:[#allocation5_spill] sm:$0xff] }
 0x1be   :  { %1291 = vst.msk [vmem:[%s3415_s4 + $0xa0] sm:$0xff] %vm82_vm1, %v1227_v52  ;;  %1292 = vst.msk [vmem:[%s3415_s4 + $0xa8] sm:$0xff] %vm82_vm1, %v1228_v4  ;;  %v1251_v60 = vmax.f32 %v3635_v48, 0.0  ;;  %v1252_v3 = vmax.f32 %v3636_v9, 0.0  ;;  %v3637_v46 = vld [vmem:[#allocation29_spill] sm:$0xff]  ;;  %v1255_v11 = vmax.f32 %v3029_v29, 0.0 }
 0x1bf   :  { %1293 = vst.msk [vmem:[%s3415_s4 + $0xb0] sm:$0xff] %vm82_vm1, %v1229_v1  ;;  %1294 = vst.msk [vmem:[%s3415_s4 + $0xb8] sm:$0xff] %vm82_vm1, %v1230_v12  ;;  %v1254_v44 = vmax.f32 %v3637_v46, 0.0  ;;  %v3638_v7 = vld [vmem:[#allocation31_spill] sm:$0xff]  ;;  %v1257_v22 = vmax.f32 %v3037_v38, 0.0  ;;  %v1258_v31 = vmax.f32 %v3041_v6, 0.0 }
 0x1c0   :  { %1295 = vst.msk [vmem:[%s3415_s4 + $0xc0] sm:$0xff] %vm82_vm1, %v1231_v10  ;;  %1296 = vst.msk [vmem:[%s3415_s4 + $0xc8] sm:$0xff] %vm82_vm1, %v1232_v21  ;;  %v1256_v24 = vmax.f32 %v3638_v7, 0.0  ;;  %v1259_v29 = vmax.f32 %v3045_v54, 0.0  ;;  %v1260_v38 = vmax.f32 %v3049_v8, 0.0  ;;  %v1261_v6 = vmax.f32 %v3053_v30, 0.0 }
 0x1c1   :  { %1297 = vst.msk [vmem:[%s3415_s4 + $0xd0] sm:$0xff] %vm82_vm1, %v1233_v19  ;;  %1298 = vst.msk [vmem:[%s3415_s4 + $0xd8] sm:$0xff] %vm82_vm1, %v1234_v35  ;;  %v1262_v40 = vmax.f32 %v3057_v41, 0.0  ;;  %v1263_v54 = vmax.f32 %v3061_v55, 0.0  ;;  %v1264_v8 = vmax.f32 %v3065_v32, 0.0  ;;  %v3639_v30 = vld [vmem:[#allocation30_spill] sm:$0xff] }
 0x1c2   :  { %1299 = vst.msk [vmem:[%s3415_s4 + $0xe0] sm:$0xff] %vm82_vm1, %v1235_v33  ;;  %1300 = vst.msk [vmem:[%s3415_s4 + $0xe8] sm:$0xff] %vm82_vm1, %v1236_v49  ;;  %v1265_v41 = vmax.f32 %v3639_v30, 0.0  ;;  %v3640_v20 = vld [vmem:[#allocation32_spill] sm:$0xff]  ;;  %v3642_v27 = vld [vmem:[#allocation19_spill] sm:$0xff]  ;;  %v1270_v50 = vmax.f32 %v3089_v2, 0.0 }
 0x1c3   :  { %1301 = vst.msk [vmem:[%s3415_s4 + $0xf0] sm:$0xff] %vm82_vm1, %v1237_v47  ;;  %1302 = vst.msk [vmem:[%s3415_s4 + $0xf8] sm:$0xff] %vm82_vm1, %v1238_v63  ;;  %v1266_v45 = vmax.f32 %v3640_v20, 0.0  ;;  %v3641_v55 = vld [vmem:[#allocation20_spill] sm:$0xff]  ;;  %v1268_v25 = vmax.f32 %v3642_v27, 0.0  ;;  %v3643_v51 = vld [vmem:[#allocation23_spill] sm:$0xff] }
 0x1c4   :  { %1303 = vst.msk [vmem:[%s3415_s4 + $0x100] sm:$0xff] %vm82_vm1, %v1239_v61  ;;  %1304 = vst.msk [vmem:[%s3415_s4 + $0x108] sm:$0xff] %vm82_vm1, %v1240_v17  ;;  %v1267_v32 = vmax.f32 %v3641_v55, 0.0  ;;  %v1269_v43 = vmax.f32 %v3643_v51, 0.0 }
 0x1c5   :  { %1305 = vst.msk [vmem:[%s3415_s4 + $0x110] sm:$0xff] %vm82_vm1, %v1241_v15  ;;  %1306 = vst.msk [vmem:[%s3415_s4 + $0x118] sm:$0xff] %vm82_vm1, %v1242_v37 }
 0x1c6   :  { %1307 = vst.msk [vmem:[%s3415_s4 + $0x120] sm:$0xff] %vm82_vm1, %v1243_v34  ;;  %1308 = vst.msk [vmem:[%s3415_s4 + $0x128] sm:$0xff] %vm82_vm1, %v1244_v56 }
 0x1c7   :  { %1309 = vst.msk [vmem:[%s3415_s4 + $0x130] sm:$0xff] %vm82_vm1, %v1245_v53  ;;  %1310 = vst.msk [vmem:[%s3415_s4 + $0x138] sm:$0xff] %vm82_vm1, %v1246_v16 }
 0x1c8   :  { %1311 = vst.msk [vmem:[%s3415_s4 + $0x140] sm:$0xff] %vm82_vm1, %v1247_v28  ;;  %1312 = vst.msk [vmem:[%s3415_s4 + $0x148] sm:$0xff] %vm82_vm1, %v1248_v18 }
 0x1c9   :  { %1313 = vst.msk [vmem:[%s3415_s4 + $0x150] sm:$0xff] %vm82_vm1, %v1249_v14  ;;  %1314 = vst.msk [vmem:[%s3415_s4 + $0x158] sm:$0xff] %vm82_vm1, %v1250_v0 }
 0x1ca   :  { %1315 = vst.msk [vmem:[%s3415_s4 + $0x160] sm:$0xff] %vm82_vm1, %v1251_v60  ;;  %1316 = vst.msk [vmem:[%s3415_s4 + $0x168] sm:$0xff] %vm82_vm1, %v1252_v3 }
 0x1cb   :  { %1317 = vst.msk [vmem:[%s3415_s4 + $0x170] sm:$0xff] %vm82_vm1, %v1253_v39  ;;  %1318 = vst.msk [vmem:[%s3415_s4 + $0x178] sm:$0xff] %vm82_vm1, %v1254_v44 }
 0x1cc   :  { %1319 = vst.msk [vmem:[%s3415_s4 + $0x180] sm:$0xff] %vm82_vm1, %v1255_v11  ;;  %1320 = vst.msk [vmem:[%s3415_s4 + $0x188] sm:$0xff] %vm82_vm1, %v1256_v24 }
 0x1cd   :  { %1321 = vst.msk [vmem:[%s3415_s4 + $0x190] sm:$0xff] %vm82_vm1, %v1257_v22  ;;  %1322 = vst.msk [vmem:[%s3415_s4 + $0x198] sm:$0xff] %vm82_vm1, %v1258_v31 }
 0x1ce   :  { %1323 = vst.msk [vmem:[%s3415_s4 + $0x1a0] sm:$0xff] %vm82_vm1, %v1259_v29  ;;  %1324 = vst.msk [vmem:[%s3415_s4 + $0x1a8] sm:$0xff] %vm82_vm1, %v1260_v38 }
 0x1cf   :  { %1325 = vst.msk [vmem:[%s3415_s4 + $0x1b0] sm:$0xff] %vm82_vm1, %v1261_v6  ;;  %1326 = vst.msk [vmem:[%s3415_s4 + $0x1b8] sm:$0xff] %vm82_vm1, %v1262_v40 }
 0x1d0   :  { %1327 = vst.msk [vmem:[%s3415_s4 + $0x1c0] sm:$0xff] %vm82_vm1, %v1263_v54  ;;  %1328 = vst.msk [vmem:[%s3415_s4 + $0x1c8] sm:$0xff] %vm82_vm1, %v1264_v8 }
 0x1d1   :  { %1329 = vst.msk [vmem:[%s3415_s4 + $0x1d0] sm:$0xff] %vm82_vm1, %v1265_v41  ;;  %1330 = vst.msk [vmem:[%s3415_s4 + $0x1d8] sm:$0xff] %vm82_vm1, %v1266_v45 }
 0x1d2   :  { %1331 = vst.msk [vmem:[%s3415_s4 + $0x1e0] sm:$0xff] %vm82_vm1, %v1267_v32  ;;  %1332 = vst.msk [vmem:[%s3415_s4 + $0x1e8] sm:$0xff] %vm82_vm1, %v1268_v25 }
 0x1d3   :  { %1333 = vst.msk [vmem:[%s3415_s4 + $0x1f0] sm:$0xff] %vm82_vm1, %v1269_v43  ;;  %1334 = vst.msk [vmem:[%s3415_s4 + $0x1f8] sm:$0xff] %vm82_vm1, %v1270_v50 }

</bundles_post_ra>
